<compile_context>
chip_gen: v7x
topology: tpu7x:2x2x1
jax: 0.10.0
libtpu: 0.0.40
codegen_flags: <defaults>
</compile_context>

<pallas_src>
import functools
import math

import jax
import jax.numpy as jnp
from jax import lax
from jax.experimental import pallas as pl
from jax.experimental.pallas import tpu as pltpu


def _round_up(x, m):
    return ((x + m - 1) // m) * m


def _device_kind():
    try:
        return jax.devices()[0].device_kind.lower()
    except Exception:
        return ""


def _is_v7(kind):
    return "v7" in kind


def _default_tiles(kind):
    # Larger tiles raise arithmetic intensity on the streamed contrast operand
    # (~tm FLOPs/byte) and amortize the ~0.35us fixed cost per grid step.
    if _is_v7(kind):
        return 512, 512          # 64 MiB physical VMEM -> keep headroom
    if ("v5 lite" in kind) or ("v5e" in kind) or ("v5lite" in kind):
        return 512, 512          # most HBM-BW-starved generation: keep tm high
    if "v6" in kind:
        return 512, 1024
    return 512, 512


def _vmem_limits(kind):
    """Returns (vmem_limit_bytes for Mosaic, tile-selection VMEM budget)."""
    if _is_v7(kind):
        return 48 << 20, 34 << 20
    if ("v5e" in kind) or ("v5 lite" in kind) or ("v5lite" in kind) or ("v6" in kind):
        return 64 << 20, 44 << 20
    return 32 << 20, 24 << 20    # unknown / older devices: keep the old safe limit


def _select_tiles(b, dp, itemsize, kind, tm_req, tk_req, budget):
    d_tm, d_tk = _default_tiles(kind)
    tm_ = d_tm if tm_req is None else int(tm_req)
    tk_ = d_tk if tk_req is None else int(tk_req)
    tm_ = max(8, _round_up(tm_, 8))
    tk_ = max(128, _round_up(tk_, 128))

    # Per-step VMEM estimate: double-buffered feature blocks + a few (tm,tk) f32 temps.
    def est(tm_c, tk_c):
        return 2 * itemsize * dp * (tm_c + tk_c) + 4 * 4 * tm_c * tk_c

    while est(tm_, tk_) > budget and tk_ > 128:
        tk_ = max(128, (tk_ // 2) // 128 * 128)
    while est(tm_, tk_) > budget and tm_ > 8:
        tm_ = max(8, (tm_ // 2) // 8 * 8)

    b128 = _round_up(b, 128)
    if tk_ >= b128:
        # Whole batch fits in one column block: size that block exactly (a block
        # dim equal to the full array dim is exempt from the 128-lane rule) and
        # never let the row tile exceed the padded batch.
        tm_ = min(tm_, b128)
        bp = _round_up(b, math.lcm(tm_, 128))
        tk_ = bp
    else:
        # Keep the preferred tiles; pad the batch to a common multiple instead of
        # collapsing tm (padded rows/columns are masked in-kernel).
        bp = _round_up(b, math.lcm(tm_, tk_))

    # v7x has 2 TensorCores: make sure the 'parallel' row axis has >= 2 blocks.
    if _is_v7(kind) and bp // tm_ < 2:
        cand = (tm_ // 2) // 8 * 8
        while cand >= 8 and bp % cand != 0:
            cand -= 8
        if cand >= 8:
            tm_ = cand
    return tm_, tk_, bp


def _supcon_kernel(lc_ref, lr_ref, a_ref, bt_ref, out_ref,
                   m_sc, z_sc, s_sc, n_sc, *,
                   inv_t, loss_scale, scale_weight, fac_label,
                   b_orig, tm, tk, normalized):
    i = pl.program_id(0)
    k = pl.program_id(1)
    nk = pl.num_programs(1)

    @pl.when(k == 0)
    def _():
        if not normalized:
            m_sc[...] = jnp.full_like(m_sc, -jnp.inf)
        z_sc[...] = jnp.zeros_like(z_sc)
        s_sc[...] = jnp.zeros_like(s_sc)
        n_sc[...] = jnp.zeros_like(n_sc)

    lc = lc_ref[...]                                    # (tm, 1)  int32 row labels
    lr = lr_ref[...]                                    # (1, tk)  int32 column labels

    # Raw similarities (temperature folded into exp/finalize). Canonical (1,0) MXU
    # contraction; accumulation is f32 regardless of input dtype.
    adc = jnp.dot(a_ref[...], bt_ref[...],
                  preferred_element_type=jnp.float32)   # (tm, tk) f32

    row_lo = i * tm
    col_lo = k * tk
    # Only diagonal-overlapping tiles and tiles containing padded columns need the
    # per-element masking; the common interior tile takes the mask-free fast path.
    is_diag = (row_lo < col_lo + tk) & (col_lo < row_lo + tm)
    has_pad_cols = (col_lo + tk) > b_orig
    needs_mask = is_diag | has_pad_cols

    m_prev = None if normalized else m_sc[...]

    def _stats(masked):
        def fn():
            if masked:
                row_g = row_lo + lax.broadcasted_iota(jnp.int32, (tm, 1), 0)
                col_g = col_lo + lax.broadcasted_iota(jnp.int32, (1, tk), 1)
                col_valid = col_g < b_orig              # padded columns
                offdiag = row_g != col_g                # no self-contrast
                keep = offdiag & col_valid
                pos = (lc == lr) & offdiag              # padded labels = sentinel
            else:
                pos = lc == lr
            # TODO(synk): on v6e/v7x the exp could be evaluated in bf16 if the EUP
            # slot is saturated; kept f32 to stay within the 1e-3 tolerance.
            if normalized:
                # Bounded-logits fast path: static max = 1.0 for L2-normalized rows.
                m_new = None
                p = jnp.exp((adc - 1.0) * inv_t)
                if masked:
                    p = jnp.where(keep, p, 0.0)
            else:
                if masked:
                    m_tile = jnp.max(jnp.where(col_valid, adc, -jnp.inf),
                                     axis=1, keepdims=True)
                    m_new = jnp.maximum(m_prev, m_tile)
                    p = jnp.exp(jnp.where(keep, (adc - m_new) * inv_t, -jnp.inf))
                else:
                    m_tile = jnp.max(adc, axis=1, keepdims=True)
                    m_new = jnp.maximum(m_prev, m_tile)
                    p = jnp.exp((adc - m_new) * inv_t)
            z_t = jnp.sum(p, axis=1, keepdims=True)
            s_t = jnp.sum(jnp.where(pos, adc, 0.0), axis=1, keepdims=True)
            n_t = jnp.sum(pos.astype(jnp.float32), axis=1, keepdims=True)
            if normalized:
                return z_t, s_t, n_t
            return m_new, z_t, s_t, n_t
        return fn

    outs = lax.cond(needs_mask, _stats(True), _stats(False))
    if normalized:
        z_t, s_t, n_t = outs
        z_sc[...] = z_sc[...] + z_t
    else:
        m_new, z_t, s_t, n_t = outs
        alpha = jnp.exp((m_prev - m_new) * inv_t)
        z_sc[...] = alpha * z_sc[...] + z_t
        m_sc[...] = m_new
    s_sc[...] += s_t
    n_sc[...] += n_t

    @pl.when(k == nk - 1)
    def _():
        n_f = n_sc[...]
        z = z_sc[...]
        log_z = jnp.log(jnp.where(z > 0.0, z, 1.0))     # guard 0*(-inf) NaNs
        m_fin = inv_t if normalized else inv_t * m_sc[...]
        # sum_j mask*log_prob = (1/T)*sum(mask*adc) - n*((1/T)*m + log Z)
        mlpp = inv_t * s_sc[...] - n_f * (m_fin + log_z)
        if fac_label is not None:
            mlpp = mlpp * jnp.where(lc == fac_label, scale_weight, 1.0)
        row_g = row_lo + lax.broadcasted_iota(jnp.int32, (tm, 1), 0)
        good = (n_f > 0.0) & (row_g < b_orig)
        per_row = jnp.where(good, mlpp / jnp.where(n_f > 0.0, n_f, 1.0), 0.0)
        part = loss_scale * jnp.sum(per_row, axis=0, keepdims=True)     # (1, 1)
        out_ref[...] = jnp.broadcast_to(part, (1, 8, 128))              # lane-dense slab


def supcon_loss(features, labels, scale_weight=1.0, fac_label=None,
                temperature=0.07, contrast_mode="all", base_temperature=0.07,
                tm=None, tk=None, normalized=False, cast_bf16=None,
                contrast_buffers=None):
    if contrast_mode != "all":
        # TODO(synk): contrast_mode='one' needs 3-D features and is not runnable in the
        # reference module without errors; only 'all' is implemented.
        raise NotImplementedError("only contrast_mode='all' is implemented")
    # TODO(synk): the labels=None / explicit-mask reference paths hit a NameError on
    # mask_scale in the PyTorch module, so only the labels path is implemented.

    feats = jnp.asarray(features)
    if feats.ndim != 2:
        raise ValueError("features must be [batch, dim]")
    b, d = feats.shape
    labels_i = jnp.asarray(labels).reshape(-1).astype(jnp.int32)
    if labels_i.shape[0] != b:
        raise ValueError("Num of labels does not match num of features")

    kind = _device_kind()
    vmem_limit, tile_budget = _vmem_limits(kind)

    # MXUs are bf16-native on all generations; for f32 inputs the cast halves feature
    # DMA bytes. It is only material (and only numerically safe wrt the reference's
    # f32 semantics) when D is large, so the auto default casts only for D >= 512.
    if cast_bf16 is None:
        cast_bf16 = bool(feats.dtype == jnp.float32 and d >= 512)
    compute_dtype = (jnp.bfloat16 if (cast_bf16 and feats.dtype == jnp.float32)
                     else feats.dtype)
    itemsize = jnp.dtype(compute_dtype).itemsize

    # Contraction dim: full-extent blocks on D are exempt from the 128-lane rule, so
    # only pad D to the sublane granule needed by the transposed operand.
    sub = 8 if itemsize >= 4 else 16
    dp = _round_up(d, sub)

    tm_, tk_, bp = _select_tiles(b, dp, itemsize, kind, tm, tk, tile_budget)

    # One padded feature slab; the pre-transposed contrast operand is derived from it
    # (single fused pad + one transpose of wrapper HBM traffic). Padded feature rows
    # are zero; padded labels use an int sentinel so they never match a real class.
    sent = jnp.iinfo(jnp.int32).min
    anchor = jnp.zeros((bp, dp), compute_dtype).at[:b, :d].set(
        feats.astype(compute_dtype))
    contrast_t = anchor.T
    labels_col = jnp.full((bp, 1), sent, jnp.int32).at[:b, 0].set(labels_i)
    labels_row = jnp.full((1, bp), sent, jnp.int32).at[0, :b].set(labels_i)

    kernel = functools.partial(
        _supcon_kernel,
        inv_t=float(1.0 / temperature),
        loss_scale=float(-(temperature / base_temperature)),
        scale_weight=float(scale_weight),
        fac_label=None if fac_label is None else int(fac_label),
        b_orig=b, tm=tm_, tk=tk_, normalized=bool(normalized))

    # Optional deeper buffering on the one streamed operand (only if profiling shows
    # exposed DMA on the contrast stream for large D).
    if contrast_buffers is not None and int(contrast_buffers) != 2:
        contrast_spec = pl.BlockSpec((dp, tk_), lambda i, k: (0, k),
                                     pipeline_mode=pl.Buffered(int(contrast_buffers)))
    else:
        contrast_spec = pl.BlockSpec((dp, tk_), lambda i, k: (0, k))

    n_row_blocks = bp // tm_
    out = pl.pallas_call(
        kernel,
        out_shape=jax.ShapeDtypeStruct((n_row_blocks, 8, 128), jnp.float32),
        grid_spec=pltpu.PrefetchScalarGridSpec(
            num_scalar_prefetch=0,
            grid=(n_row_blocks, bp // tk_),
            in_specs=[
                pl.BlockSpec((tm_, 1), lambda i, k: (i, 0)),    # row labels
                pl.BlockSpec((1, tk_), lambda i, k: (0, k)),    # column labels
                pl.BlockSpec((tm_, dp), lambda i, k: (i, 0)),   # anchor features
                contrast_spec,                                  # contrast features^T
            ],
            out_specs=pl.BlockSpec((1, 8, 128), lambda i, k: (i, 0, 0)),
            scratch_shapes=[pltpu.VMEM((tm_, 1), jnp.float32)] * 4,
        ),
        compiler_params=pltpu.CompilerParams(
            dimension_semantics=("parallel", "arbitrary"),
            vmem_limit_bytes=vmem_limit),
    )(labels_col, labels_row, anchor, contrast_t)

    # Final mean over the real batch (padded rows contribute exactly 0).
    return jnp.sum(out[:, 0, 0]) / b


def _supcon_loss_ref(features, labels, scale_weight=1.0, fac_label=None,
                     temperature=0.07, base_temperature=0.07):
    """Pure-JAX reference mirroring the PyTorch forward (labels path, mode='all')."""
    f = features.astype(jnp.float32)
    b = f.shape[0]
    lab = jnp.asarray(labels).reshape(b, 1)
    mask = (lab == lab.T).astype(jnp.float32)
    if fac_label is None:
        mask_scale = mask
    else:
        is_fac = (lab == fac_label).astype(jnp.float32)
        mask_scale = mask * (1.0 + is_fac * (scale_weight - 1.0))
    adc = (f @ f.T) / temperature
    logits = adc - jnp.max(adc, axis=1, keepdims=True)
    logits_mask = 1.0 - jnp.eye(b, dtype=jnp.float32)
    mask = mask * logits_mask
    mask_scale = mask_scale * logits_mask
    exp_logits = jnp.exp(logits) * logits_mask
    log_prob = logits - jnp.log(jnp.sum(exp_logits, axis=1, keepdims=True))
    mlpp = jnp.sum(mask_scale * log_prob, axis=1)
    msum = jnp.sum(mask, axis=1)
    mlpp = mlpp * jnp.where(msum == 0.0, 0.0, 1.0 / msum)
    return jnp.mean(-(temperature / base_temperature) * mlpp)


if __name__ == "__main__":
    key = jax.random.PRNGKey(0)
    k1, k2, k3, k4 = jax.random.split(key, 4)

    # --- Test 1: bf16 features, single (padded) tile, fac_label scaling ----------------
    B, D = 8, 32
    f32 = jax.random.normal(k1, (B, D), jnp.float32)
    f32 = f32 / jnp.linalg.norm(f32, axis=1, keepdims=True)
    f_bf16 = f32.astype(jnp.bfloat16)
    labels = jnp.array([0, 1, 0, 1, 2, 2, 0, 1], jnp.int32)

    loss_bf16 = jax.block_until_ready(
        supcon_loss(f_bf16, labels, scale_weight=2.0, fac_label=1))
    ref_bf16 = _supcon_loss_ref(f_bf16, labels, 2.0, 1)
    assert jnp.allclose(loss_bf16, ref_bf16, rtol=1e-3, atol=1e-3), (loss_bf16, ref_bf16)

    # --- Test 2: f32 features (no bf16 cast at small D) ---------------------------------
    loss_f32 = jax.block_until_ready(
        supcon_loss(f32, labels, scale_weight=2.0, fac_label=1))
    ref_f32 = _supcon_loss_ref(f32, labels, 2.0, 1)
    assert jnp.allclose(loss_f32, ref_f32, rtol=1e-3, atol=1e-3), (loss_f32, ref_f32)

    # --- Test 3: multi-tile grid (fast interior tile + diagonal + padded-column tiles),
    #             bf16, small explicit tiles, D not a multiple of 128 -------------------
    B2, D2 = 200, 48
    g = jax.random.normal(k2, (B2, D2), jnp.float32)
    g = (g / jnp.linalg.norm(g, axis=1, keepdims=True)).astype(jnp.bfloat16)
    labels2 = jax.random.randint(k3, (B2,), 0, 5)
    loss_mt = jax.block_until_ready(supcon_loss(g, labels2, tm=128, tk=128))
    ref_mt = _supcon_loss_ref(g, labels2)
    assert jnp.allclose(loss_mt, ref_mt, rtol=1e-3, atol=1e-3), (loss_mt, ref_mt)

    # --- Test 4: default (large) tile selection, plus the normalized fast path ----------
    B3, D3 = 384, 96
    h = jax.random.normal(k4, (B3, D3), jnp.float32)
    h = h / jnp.linalg.norm(h, axis=1, keepdims=True)
    labels3 = jax.random.randint(k1, (B3,), 0, 7)
    loss_dflt = jax.block_until_ready(supcon_loss(h, labels3))
    loss_norm = jax.block_until_ready(supcon_loss(h, labels3, normalized=True))
    ref_big = _supcon_loss_ref(h, labels3)
    assert jnp.allclose(loss_dflt, ref_big, rtol=1e-3, atol=1e-3), (loss_dflt, ref_big)
    assert jnp.allclose(loss_norm, ref_big, rtol=1e-3, atol=1e-3), (loss_norm, ref_big)

    print("KERNEL_OK")
</pallas_src>

<mosaic_0001>
module attributes {stable_mosaic.version = 11 : i64} {
  func.func @_supcon_kernel(%arg0: i32, %arg1: i32, %arg2: memref<128x1xi32, #tpu.memory_space<vmem>>, %arg3: memref<1x128xi32, #tpu.memory_space<vmem>>, %arg4: memref<128x32xbf16, #tpu.memory_space<vmem>>, %arg5: memref<32x128xbf16, #tpu.memory_space<vmem>>, %arg6: memref<1x8x128xf32, #tpu.memory_space<vmem>>, %arg7: memref<128x1xf32, #tpu.memory_space<vmem>>, %arg8: memref<128x1xf32, #tpu.memory_space<vmem>>, %arg9: memref<128x1xf32, #tpu.memory_space<vmem>>, %arg10: memref<128x1xf32, #tpu.memory_space<vmem>>) attributes {dimension_semantics = [#tpu.dimension_semantics<parallel>, #tpu.dimension_semantics<arbitrary>], iteration_bounds = array<i64: 1, 1>, scalar_prefetch = 0 : i64, scratch_operands = 4 : i64, tpu.core_type = #tpu.core_type<tc>, window_params = [{transform_indices = @transform_0, window_bounds = array<i64: 128, 1>}, {transform_indices = @transform_1, window_bounds = array<i64: 1, 128>}, {transform_indices = @transform_2, window_bounds = array<i64: 128, 32>}, {transform_indices = @transform_3, window_bounds = array<i64: 32, 128>}, {transform_indices = @transform_4, window_bounds = array<i64: 1, 8, 128>}]} {
    %c0_i32 = arith.constant 0 : i32
    %0 = arith.cmpi eq, %arg1, %c0_i32 : i32
    %1 = arith.extui %0 : i1 to i32
    %c0_i32_0 = arith.constant 0 : i32
    %2 = arith.cmpi ne, %1, %c0_i32_0 : i32
    scf.if %2 {
      %cst_32 = arith.constant 0xFF800000 : f32
      %40 = vector.broadcast %cst_32 : f32 to vector<128x1xf32>
      %c0_33 = arith.constant 0 : index
      %c0_34 = arith.constant 0 : index
      %41 = vector.load %arg7[%c0_33, %c0_34] : memref<128x1xf32, #tpu.memory_space<vmem>>, vector<128x1xf32>
      tpu.vector_store %arg7[%c0_33, %c0_34], %40 {strides = array<i32>} : memref<128x1xf32, #tpu.memory_space<vmem>>, vector<128x1xf32>,
      %cst_35 = arith.constant 0.000000e+00 : f32
      %42 = vector.broadcast %cst_35 : f32 to vector<128x1xf32>
      %c0_36 = arith.constant 0 : index
      %c0_37 = arith.constant 0 : index
      %43 = vector.load %arg8[%c0_36, %c0_37] : memref<128x1xf32, #tpu.memory_space<vmem>>, vector<128x1xf32>
      tpu.vector_store %arg8[%c0_36, %c0_37], %42 {strides = array<i32>} : memref<128x1xf32, #tpu.memory_space<vmem>>, vector<128x1xf32>,
      %cst_38 = arith.constant 0.000000e+00 : f32
      %44 = vector.broadcast %cst_38 : f32 to vector<128x1xf32>
      %c0_39 = arith.constant 0 : index
      %c0_40 = arith.constant 0 : index
      %45 = vector.load %arg9[%c0_39, %c0_40] : memref<128x1xf32, #tpu.memory_space<vmem>>, vector<128x1xf32>
      tpu.vector_store %arg9[%c0_39, %c0_40], %44 {strides = array<i32>} : memref<128x1xf32, #tpu.memory_space<vmem>>, vector<128x1xf32>,
      %cst_41 = arith.constant 0.000000e+00 : f32
      %46 = vector.broadcast %cst_41 : f32 to vector<128x1xf32>
      %c0_42 = arith.constant 0 : index
      %c0_43 = arith.constant 0 : index
      %47 = vector.load %arg10[%c0_42, %c0_43] : memref<128x1xf32, #tpu.memory_space<vmem>>, vector<128x1xf32>
      tpu.vector_store %arg10[%c0_42, %c0_43], %46 {strides = array<i32>} : memref<128x1xf32, #tpu.memory_space<vmem>>, vector<128x1xf32>,
    } else {
    }
    %c0 = arith.constant 0 : index
    %c0_1 = arith.constant 0 : index
    %3 = vector.load %arg2[%c0, %c0_1] : memref<128x1xi32, #tpu.memory_space<vmem>>, vector<128x1xi32>
    %c0_2 = arith.constant 0 : index
    %c0_3 = arith.constant 0 : index
    %4 = vector.load %arg3[%c0_2, %c0_3] : memref<1x128xi32, #tpu.memory_space<vmem>>, vector<1x128xi32>
    %c0_4 = arith.constant 0 : index
    %c0_5 = arith.constant 0 : index
    %5 = vector.load %arg4[%c0_4, %c0_5] : memref<128x32xbf16, #tpu.memory_space<vmem>>, vector<128x32xbf16>
    %c0_6 = arith.constant 0 : index
    %c0_7 = arith.constant 0 : index
    %6 = vector.load %arg5[%c0_6, %c0_7] : memref<32x128xbf16, #tpu.memory_space<vmem>>, vector<32x128xbf16>
    %cst = arith.constant dense<0.000000e+00> : vector<128x128xf32>
    %7 = tpu.matmul %5, %6, %cst {dimension_numbers = #tpu.dot_dimension_numbers<[1], [0], [0], [1], [0, 0, 1, 1], [], []>} : vector<128x32xbf16>, vector<32x128xbf16>, vector<128x128xf32> -> vector<128x128xf32>
    %c128_i32 = arith.constant 128 : i32
    %8 = arith.muli %arg0, %c128_i32 : i32
    %c128_i32_8 = arith.constant 128 : i32
    %9 = arith.muli %arg1, %c128_i32_8 : i32
    %c128_i32_9 = arith.constant 128 : i32
    %10 = arith.addi %9, %c128_i32_9 : i32
    %11 = arith.cmpi slt, %8, %10 : i32
    %c128_i32_10 = arith.constant 128 : i32
    %12 = arith.addi %8, %c128_i32_10 : i32
    %13 = arith.cmpi slt, %9, %12 : i32
    %14 = arith.andi %11, %13 : i1
    %c128_i32_11 = arith.constant 128 : i32
    %15 = arith.addi %9, %c128_i32_11 : i32
    %c8_i32 = arith.constant 8 : i32
    %16 = arith.cmpi sgt, %15, %c8_i32 : i32
    %17 = arith.ori %14, %16 : i1
    %c0_12 = arith.constant 0 : index
    %c0_13 = arith.constant 0 : index
    %18 = vector.load %arg7[%c0_12, %c0_13] : memref<128x1xf32, #tpu.memory_space<vmem>>, vector<128x1xf32>
    %19 = arith.extui %17 : i1 to i32
    %c0_i32_14 = arith.constant 0 : i32
    %20 = arith.cmpi ne, %19, %c0_i32_14 : i32
    %21:4 = scf.if %20 -> (vector<128x1xf32>, vector<128x1xf32>, vector<128x1xf32>, vector<128x1xf32>) {
      %40 = tpu.iota {dimensions = array<i32: 0>} : vector<128x1xi32>
      %41 = vector.broadcast %8 : i32 to vector<128x1xi32>
      %42 = arith.addi %41, %40 : vector<128x1xi32>
      %43 = tpu.iota {dimensions = array<i32: 1>} : vector<1x128xi32>
      %44 = vector.broadcast %9 : i32 to vector<1x128xi32>
      %45 = arith.addi %44, %43 : vector<1x128xi32>
      %c8_i32_32 = arith.constant 8 : i32
      %46 = vector.broadcast %c8_i32_32 : i32 to vector<1x128xi32>
      %47 = arith.cmpi slt, %45, %46 : vector<1x128xi32>
      %48 = vector.broadcast %42 : vector<128x1xi32> to vector<128x128xi32>
      %49 = vector.broadcast %45 : vector<1x128xi32> to vector<128x128xi32>
      %50 = arith.cmpi ne, %48, %49 : vector<128x128xi32>
      %51 = vector.broadcast %47 : vector<1x128xi1> to vector<128x128xi1>
      %52 = arith.andi %50, %51 : vector<128x128xi1>
      %53 = vector.broadcast %3 : vector<128x1xi32> to vector<128x128xi32>
      %54 = vector.broadcast %4 : vector<1x128xi32> to vector<128x128xi32>
      %55 = arith.cmpi eq, %53, %54 : vector<128x128xi32>
      %56 = arith.andi %55, %50 : vector<128x128xi1>
      %cst_33 = arith.constant 0xFF800000 : f32
      %57 = vector.shape_cast %47 : vector<1x128xi1> to vector<1x128xi1>
      %58 = vector.broadcast %57 : vector<1x128xi1> to vector<128x128xi1>
      %59 = vector.broadcast %cst_33 : f32 to vector<128x128xf32>
      %60 = arith.select %58, %7, %59 : vector<128x128xi1>, vector<128x128xf32>
      %cst_34 = arith.constant dense<0xFF800000> : vector<128xf32>
      %61 = vector.multi_reduction <maximumf>, %60, %cst_34 [1] : vector<128x128xf32> to vector<128xf32>
      %62 = vector.shape_cast %61 : vector<128xf32> to vector<128x1xf32>
      %63 = arith.maximumf %18, %62 : vector<128x1xf32>
      %64 = vector.broadcast %63 : vector<128x1xf32> to vector<128x128xf32>
      %65 = arith.subf %7, %64 : vector<128x128xf32>
      %cst_35 = arith.constant 14.2857141 : f32
      %66 = vector.broadcast %cst_35 : f32 to vector<128x128xf32>
      %67 = arith.mulf %65, %66 : vector<128x128xf32>
      %cst_36 = arith.constant 0xFF800000 : f32
      %68 = vector.broadcast %cst_36 : f32 to vector<128x128xf32>
      %69 = arith.select %52, %67, %68 : vector<128x128xi1>, vector<128x128xf32>
      %70 = math.exp %69 : vector<128x128xf32>
      %cst_37 = arith.constant dense<0.000000e+00> : vector<128xf32>
      %71 = vector.multi_reduction <add>, %70, %cst_37 [1] : vector<128x128xf32> to vector<128xf32>
      %72 = vector.shape_cast %71 : vector<128xf32> to vector<128x1xf32>
      %cst_38 = arith.constant 0.000000e+00 : f32
      %73 = vector.broadcast %cst_38 : f32 to vector<128x128xf32>
      %74 = arith.select %56, %7, %73 : vector<128x128xi1>, vector<128x128xf32>
      %cst_39 = arith.constant dense<0.000000e+00> : vector<128xf32>
      %75 = vector.multi_reduction <add>, %74, %cst_39 [1] : vector<128x128xf32> to vector<128xf32>
      %76 = vector.shape_cast %75 : vector<128xf32> to vector<128x1xf32>
      %77 = arith.extui %56 : vector<128x128xi1> to vector<128x128xi32>
      %78 = arith.sitofp %77 : vector<128x128xi32> to vector<128x128xf32>
      %cst_40 = arith.constant dense<0.000000e+00> : vector<128xf32>
      %79 = vector.multi_reduction <add>, %78, %cst_40 [1] : vector<128x128xf32> to vector<128xf32>
      %80 = vector.shape_cast %79 : vector<128xf32> to vector<128x1xf32>
      scf.yield %63, %72, %76, %80 : vector<128x1xf32>, vector<128x1xf32>, vector<128x1xf32>, vector<128x1xf32>
    } else {
      %40 = vector.broadcast %3 : vector<128x1xi32> to vector<128x128xi32>
      %41 = vector.broadcast %4 : vector<1x128xi32> to vector<128x128xi32>
      %42 = arith.cmpi eq, %40, %41 : vector<128x128xi32>
      %cst_32 = arith.constant dense<0xFF800000> : vector<128xf32>
      %43 = vector.multi_reduction <maximumf>, %7, %cst_32 [1] : vector<128x128xf32> to vector<128xf32>
      %44 = vector.shape_cast %43 : vector<128xf32> to vector<128x1xf32>
      %45 = arith.maximumf %18, %44 : vector<128x1xf32>
      %46 = vector.broadcast %45 : vector<128x1xf32> to vector<128x128xf32>
      %47 = arith.subf %7, %46 : vector<128x128xf32>
      %cst_33 = arith.constant 14.2857141 : f32
      %48 = vector.broadcast %cst_33 : f32 to vector<128x128xf32>
      %49 = arith.mulf %47, %48 : vector<128x128xf32>
      %50 = math.exp %49 : vector<128x128xf32>
      %cst_34 = arith.constant dense<0.000000e+00> : vector<128xf32>
      %51 = vector.multi_reduction <add>, %50, %cst_34 [1] : vector<128x128xf32> to vector<128xf32>
      %52 = vector.shape_cast %51 : vector<128xf32> to vector<128x1xf32>
      %cst_35 = arith.constant 0.000000e+00 : f32
      %53 = vector.broadcast %cst_35 : f32 to vector<128x128xf32>
      %54 = arith.select %42, %7, %53 : vector<128x128xi1>, vector<128x128xf32>
      %cst_36 = arith.constant dense<0.000000e+00> : vector<128xf32>
      %55 = vector.multi_reduction <add>, %54, %cst_36 [1] : vector<128x128xf32> to vector<128xf32>
      %56 = vector.shape_cast %55 : vector<128xf32> to vector<128x1xf32>
      %57 = arith.extui %42 : vector<128x128xi1> to vector<128x128xi32>
      %58 = arith.sitofp %57 : vector<128x128xi32> to vector<128x128xf32>
      %cst_37 = arith.constant dense<0.000000e+00> : vector<128xf32>
      %59 = vector.multi_reduction <add>, %58, %cst_37 [1] : vector<128x128xf32> to vector<128xf32>
      %60 = vector.shape_cast %59 : vector<128xf32> to vector<128x1xf32>
      scf.yield %45, %52, %56, %60 : vector<128x1xf32>, vector<128x1xf32>, vector<128x1xf32>, vector<128x1xf32>
    }
    %22 = arith.subf %18, %21#0 : vector<128x1xf32>
    %cst_15 = arith.constant 14.2857141 : f32
    %23 = vector.broadcast %cst_15 : f32 to vector<128x1xf32>
    %24 = arith.mulf %22, %23 : vector<128x1xf32>
    %25 = math.exp %24 : vector<128x1xf32>
    %c0_16 = arith.constant 0 : index
    %c0_17 = arith.constant 0 : index
    %26 = vector.load %arg8[%c0_16, %c0_17] : memref<128x1xf32, #tpu.memory_space<vmem>>, vector<128x1xf32>
    %27 = arith.mulf %25, %26 : vector<128x1xf32>
    %28 = arith.addf %27, %21#1 : vector<128x1xf32>
    %c0_18 = arith.constant 0 : index
    %c0_19 = arith.constant 0 : index
    %29 = vector.load %arg8[%c0_18, %c0_19] : memref<128x1xf32, #tpu.memory_space<vmem>>, vector<128x1xf32>
    tpu.vector_store %arg8[%c0_18, %c0_19], %28 {strides = array<i32>} : memref<128x1xf32, #tpu.memory_space<vmem>>, vector<128x1xf32>,
    %c0_20 = arith.constant 0 : index
    %c0_21 = arith.constant 0 : index
    %30 = vector.load %arg7[%c0_20, %c0_21] : memref<128x1xf32, #tpu.memory_space<vmem>>, vector<128x1xf32>
    tpu.vector_store %arg7[%c0_20, %c0_21], %21#0 {strides = array<i32>} : memref<128x1xf32, #tpu.memory_space<vmem>>, vector<128x1xf32>,
    %c0_22 = arith.constant 0 : index
    %c0_23 = arith.constant 0 : index
    %31 = vector.load %arg9[%c0_22, %c0_23] : memref<128x1xf32, #tpu.memory_space<vmem>>, vector<128x1xf32>
    %32 = arith.addf %31, %21#2 : vector<128x1xf32>
    %c0_24 = arith.constant 0 : index
    %c0_25 = arith.constant 0 : index
    %33 = vector.load %arg9[%c0_24, %c0_25] : memref<128x1xf32, #tpu.memory_space<vmem>>, vector<128x1xf32>
    tpu.vector_store %arg9[%c0_24, %c0_25], %32 {strides = array<i32>} : memref<128x1xf32, #tpu.memory_space<vmem>>, vector<128x1xf32>,
    %c0_26 = arith.constant 0 : index
    %c0_27 = arith.constant 0 : index
    %34 = vector.load %arg10[%c0_26, %c0_27] : memref<128x1xf32, #tpu.memory_space<vmem>>, vector<128x1xf32>
    %35 = arith.addf %34, %21#3 : vector<128x1xf32>
    %c0_28 = arith.constant 0 : index
    %c0_29 = arith.constant 0 : index
    %36 = vector.load %arg10[%c0_28, %c0_29] : memref<128x1xf32, #tpu.memory_space<vmem>>, vector<128x1xf32>
    tpu.vector_store %arg10[%c0_28, %c0_29], %35 {strides = array<i32>} : memref<128x1xf32, #tpu.memory_space<vmem>>, vector<128x1xf32>,
    %c0_i32_30 = arith.constant 0 : i32
    %37 = arith.cmpi eq, %arg1, %c0_i32_30 : i32
    %38 = arith.extui %37 : i1 to i32
    %c0_i32_31 = arith.constant 0 : i32
    %39 = arith.cmpi ne, %38, %c0_i32_31 : i32
    scf.if %39 {
      %c0_32 = arith.constant 0 : index
      %c0_33 = arith.constant 0 : index
      %40 = vector.load %arg10[%c0_32, %c0_33] : memref<128x1xf32, #tpu.memory_space<vmem>>, vector<128x1xf32>
      %c0_34 = arith.constant 0 : index
      %c0_35 = arith.constant 0 : index
      %41 = vector.load %arg8[%c0_34, %c0_35] : memref<128x1xf32, #tpu.memory_space<vmem>>, vector<128x1xf32>
      %cst_36 = arith.constant 0.000000e+00 : f32
      %42 = vector.broadcast %cst_36 : f32 to vector<128x1xf32>
      %43 = arith.cmpf ogt, %41, %42 : vector<128x1xf32>
      %cst_37 = arith.constant 1.000000e+00 : f32
      %44 = vector.broadcast %cst_37 : f32 to vector<128x1xf32>
      %45 = arith.select %43, %41, %44 : vector<128x1xi1>, vector<128x1xf32>
      %46 = math.log %45 : vector<128x1xf32>
      %c0_38 = arith.constant 0 : index
      %c0_39 = arith.constant 0 : index
      %47 = vector.load %arg7[%c0_38, %c0_39] : memref<128x1xf32, #tpu.memory_space<vmem>>, vector<128x1xf32>
      %cst_40 = arith.constant 14.2857141 : f32
      %48 = vector.broadcast %cst_40 : f32 to vector<128x1xf32>
      %49 = arith.mulf %48, %47 : vector<128x1xf32>
      %c0_41 = arith.constant 0 : index
      %c0_42 = arith.constant 0 : index
      %50 = vector.load %arg9[%c0_41, %c0_42] : memref<128x1xf32, #tpu.memory_space<vmem>>, vector<128x1xf32>
      %cst_43 = arith.constant 14.2857141 : f32
      %51 = vector.broadcast %cst_43 : f32 to vector<128x1xf32>
      %52 = arith.mulf %51, %50 : vector<128x1xf32>
      %53 = arith.addf %49, %46 : vector<128x1xf32>
      %54 = arith.mulf %40, %53 : vector<128x1xf32>
      %55 = arith.subf %52, %54 : vector<128x1xf32>
      %c1_i32 = arith.constant 1 : i32
      %56 = vector.broadcast %c1_i32 : i32 to vector<128x1xi32>
      %57 = arith.cmpi eq, %3, %56 : vector<128x1xi32>
      %cst_44 = arith.constant 2.000000e+00 : f32
      %cst_45 = arith.constant 1.000000e+00 : f32
      %58 = vector.broadcast %cst_44 : f32 to vector<128x1xf32>
      %59 = vector.broadcast %cst_45 : f32 to vector<128x1xf32>
      %60 = arith.select %57, %58, %59 : vector<128x1xi1>, vector<128x1xf32>
      %61 = arith.mulf %55, %60 : vector<128x1xf32>
      %62 = tpu.iota {dimensions = array<i32: 0>} : vector<128x1xi32>
      %63 = vector.broadcast %8 : i32 to vector<128x1xi32>
      %64 = arith.addi %63, %62 : vector<128x1xi32>
      %cst_46 = arith.constant 0.000000e+00 : f32
      %65 = vector.broadcast %cst_46 : f32 to vector<128x1xf32>
      %66 = arith.cmpf ogt, %40, %65 : vector<128x1xf32>
      %c8_i32_47 = arith.constant 8 : i32
      %67 = vector.broadcast %c8_i32_47 : i32 to vector<128x1xi32>
      %68 = arith.cmpi slt, %64, %67 : vector<128x1xi32>
      %69 = arith.andi %66, %68 : vector<128x1xi1>
      %cst_48 = arith.constant 0.000000e+00 : f32
      %70 = vector.broadcast %cst_48 : f32 to vector<128x1xf32>
      %71 = arith.cmpf ogt, %40, %70 : vector<128x1xf32>
      %cst_49 = arith.constant 1.000000e+00 : f32
      %72 = vector.broadcast %cst_49 : f32 to vector<128x1xf32>
      %73 = arith.select %71, %40, %72 : vector<128x1xi1>, vector<128x1xf32>
      %74 = arith.divf %61, %73 : vector<128x1xf32>
      %cst_50 = arith.constant 0.000000e+00 : f32
      %75 = vector.broadcast %cst_50 : f32 to vector<128x1xf32>
      %76 = arith.select %69, %74, %75 : vector<128x1xi1>, vector<128x1xf32>
      %cst_51 = arith.constant dense<0.000000e+00> : vector<1xf32>
      %77 = vector.multi_reduction <add>, %76, %cst_51 [0] : vector<128x1xf32> to vector<1xf32>
      %78 = vector.shape_cast %77 : vector<1xf32> to vector<1x1xf32>
      %cst_52 = arith.constant -1.000000e+00 : f32
      %79 = vector.broadcast %cst_52 : f32 to vector<1x1xf32>
      %80 = arith.mulf %79, %78 : vector<1x1xf32>
      %81 = vector.shape_cast %80 : vector<1x1xf32> to vector<1x1x1xf32>
      %82 = vector.broadcast %81 : vector<1x1x1xf32> to vector<1x8x128xf32>
      %c0_53 = arith.constant 0 : index
      %c0_54 = arith.constant 0 : index
      %c0_55 = arith.constant 0 : index
      %83 = vector.load %arg6[%c0_53, %c0_54, %c0_55] : memref<1x8x128xf32, #tpu.memory_space<vmem>>, vector<1x8x128xf32>
      tpu.vector_store %arg6[%c0_53, %c0_54, %c0_55], %82 {strides = array<i32>} : memref<1x8x128xf32, #tpu.memory_space<vmem>>, vector<1x8x128xf32>,
    } else {
    }
    return
  }
  func.func @transform_0(%arg0: i32, %arg1: i32) -> (i32, i32) {
    %c0_i32 = arith.constant 0 : i32
    %c0_i32_0 = arith.constant 0 : i32
    return %arg0, %c0_i32 : i32, i32
  }
  func.func @transform_1(%arg0: i32, %arg1: i32) -> (i32, i32) {
    %c0_i32 = arith.constant 0 : i32
    %c0_i32_0 = arith.constant 0 : i32
    return %c0_i32, %arg1 : i32, i32
  }
  func.func @transform_2(%arg0: i32, %arg1: i32) -> (i32, i32) {
    %c0_i32 = arith.constant 0 : i32
    %c0_i32_0 = arith.constant 0 : i32
    return %arg0, %c0_i32 : i32, i32
  }
  func.func @transform_3(%arg0: i32, %arg1: i32) -> (i32, i32) {
    %c0_i32 = arith.constant 0 : i32
    %c0_i32_0 = arith.constant 0 : i32
    return %c0_i32, %arg1 : i32, i32
  }
  func.func @transform_4(%arg0: i32, %arg1: i32) -> (i32, i32, i32) {
    %c0_i32 = arith.constant 0 : i32
    %c0_i32_0 = arith.constant 0 : i32
    %c0_i32_1 = arith.constant 0 : i32
    return %arg0, %c0_i32, %c0_i32_0 : i32, i32, i32
  }
}

</mosaic_0001>

<bundles_post_ra>
// kernel: tpu_custom_call.1
= control target key start
LH: loop header
LB: loop body
LE: loop exit
PB: predicated region body
PF: predicated region fallthrough
CT: control target
= control target key end

     0   :  { %vm177_vm0 = vcmask 261120   ;;  %v2287_v5 = vmov 0   ;;  %s3381_s0 = inlined_call_operand.vmem [shape: s32[128,1], index: 0, kind: input, shape index: {}]   ;;  %s3382_s1 = inlined_call_operand.vmem [shape: s32[1,128], index: 1, kind: input, shape index: {}]   ;;  %s3383_s2 = inlined_call_operand.vmem [shape: bf16[128,32], index: 2, kind: input, shape index: {}]   ;;  %s3384_s3 = inlined_call_operand.vmem [shape: bf16[32,128], index: 3, kind: input, shape index: {}]   ;;  %s3385_s4 = inlined_call_operand.hbm [shape: f32[1,8,128], index: 4, kind: output, shape index: {}]  }
   0x1   :  { %v2184_v0 = vld [vmem:[%s3384_s3] sm:$0xff]   ;;  %v2185_v1 = vld [vmem:[%s3384_s3 + $0x8] sm:$0xff]   ;;  %2183 = vset.pattern.permute.xlu1 %v2287_v5  ;;  %2182 = vset.pattern.permute.xlu0 %v2287_v5  ;;  %v2190_v7 = vld [vmem:[%s3383_s2 + $0x10] sm:$0xff]  }
   0x2   :  { %2153 = vmatprep.subr.bf16.mxu0 %v2184_v0  ;;  %v2186_v2 = vld [vmem:[%s3383_s2] sm:$0xff]   ;;  %2173 = vmatprep.subr.bf16.mxu1 %v2184_v0  ;;  %v2187_v4 = vld [vmem:[%s3383_s2 + $0x8] sm:$0xff]   ;;  %v2192_v8 = vld [vmem:[%s3383_s2 + $0x30] sm:$0xff]  }
   0x3   :  { %2154 = vmatpush3.bf16.msra.mxu0 %v2184_v0  ;;  %2175 = vmatpush3.bf16.msra.mxu1 %v2184_v0  ;;  %v2188_v3 = vld [vmem:[%s3383_s2 + $0x20] sm:$0xff]   ;;  %v2189_v6 = vld [vmem:[%s3383_s2 + $0x28] sm:$0xff]   ;;  %v90_v11 = vld [vmem:[%s3381_s0 + $0x10] sm:$0xff] }
   0x4   :  { %2155 = vmatprep.subr.bf16.mxu0 %v2185_v1  ;;  %2157 = vmatprep.mubr.msk.bf16.mxu0 %vm177_vm0, %v2186_v2  ;;  %v89_v9 = vld [vmem:[%s3381_s0 + $0x8] sm:$0xff]  ;;  %v88_v10 = vld [vmem:[%s3381_s0] sm:$0xff] }
   0x5   :  { %2174 = vmatprep.subr.bf16.mxu1 %v2185_v1  ;;  %2165 = vmatprep.mubr.msk.bf16.mxu1 %vm177_vm0, %v2188_v3  ;;  %v100_v12 = vld [vmem:[%s3381_s0 + $0x60] sm:$0xff] }
   0x6   :  { %405 = vperm.xlu1 %2183, %v89_v9   ;;  %402 = vperm.xlu0 %2182, %v88_v10  }
   0x7   :  { %2156 = vmatpush3.bf16.msra.mxu0 %v2185_v1  ;;  %2176 = vmatpush3.bf16.msra.mxu1 %v2185_v1 }
   0xa   :  { %2158 = vmatmul.mubr.msk.bf16.vlgmr.msra.gmra.mrb[0].mxu0 %vm177_vm0, %v2187_v4  ;;  %2166 = vmatmul.mubr.msk.bf16.vlgmr.msra.gmra.mrb[0].mxu1 %vm177_vm0, %v2189_v6 }
   0xb   :  { %2161 = vmatprep.mubr.msk.bf16.mxu0 %vm177_vm0, %v2190_v7  ;;  %2169 = vmatprep.mubr.msk.bf16.mxu1 %vm177_vm0, %v2192_v8 }
   0xc   :  { %9 = vsyncpa [#allocation7], 0  ;;  %v2191_v13 = vld [vmem:[%s3383_s2 + $0x18] sm:$0xff]   ;;  %408 = vperm.xlu1 %2183, %v90_v11   ;;  %438 = vperm.xlu0 %2182, %v100_v12   ;;  %v92_v16 = vld [vmem:[%s3381_s0 + $0x20] sm:$0xff]  ;;  %v328_v24 = vlaneseq  ;;  %v3386_v43 = vmov 0.0   ;;  %vm3404_vm10 = vcmask 7168  }
   0xd   :  { %v2193_v14 = vld [vmem:[%s3383_s2 + $0x38] sm:$0xff]   ;;  %v93_v17 = vld [vmem:[%s3381_s0 + $0x28] sm:$0xff]  ;;  %v94_v18 = vld [vmem:[%s3381_s0 + $0x30] sm:$0xff]  ;;  %v2289_v50 = vmov -inf   ;;  %40 = vst.msk [vmem:[#allocation3] sm:$0xff] %vm3404_vm10, %v3386_v43 }
   0xe   :  { %v91_v15 = vld [vmem:[%s3381_s0 + $0x18] sm:$0xff]  ;;  %v2392_v26 = vand.u32 127, %v328_v24  ;;  %v2397_v27 = vld [vmem:[%s3382_s1] ss:$0 sm:$0xff]  ;;  %v2399_v29 = vshrl.u32 %v328_v24, 7  ;;  %26 = vst.msk [vmem:[#allocation2 + $0x10] sm:$0xff] %vm3404_vm10, %v2289_v50 }
   0xf   :  { %v95_v19 = vld [vmem:[%s3381_s0 + $0x38] sm:$0xff]  ;;  %24 = vst.msk [vmem:[#allocation2] sm:$0xff] %vm3404_vm10, %v2289_v50  ;;  %25 = vst.msk [vmem:[#allocation2 + $0x8] sm:$0xff] %vm3404_vm10, %v2289_v50  ;;  %v102_v63 = vld [vmem:[%s3381_s0 + $0x70] sm:$0xff] }
  0x10   :  { %411 = vperm.xlu1 %2183, %v91_v15   ;;  %vm3413_vm1 = vcmp.lt.s32.totalorder %v2392_v26, 8  ;;  %vm367_vm3 = vcmp.ne.s32.totalorder %v2399_v29, %v2392_v26  ;;  %v2406_v31 = vadd.s32 48, %v2399_v29  ;;  %v2434_v41 = vadd.s32 40, %v2399_v29  ;;  %27 = vst.msk [vmem:[#allocation2 + $0x18] sm:$0xff] %vm3404_vm10, %v2289_v50  ;;  %28 = vst.msk [vmem:[#allocation2 + $0x20] sm:$0xff] %vm3404_vm10, %v2289_v50 }
  0x11   :  { %29 = vst.msk [vmem:[#allocation2 + $0x28] sm:$0xff] %vm3404_vm10, %v2289_v50  ;;  %30 = vst.msk [vmem:[#allocation2 + $0x30] sm:$0xff] %vm3404_vm10, %v2289_v50 }
  0x12   :  { %2162 = vmatmul.mubr.msk.bf16.gmra.mrb[4].mxu0 %vm177_vm0, %v2191_v13  ;;  %2170 = vmatmul.mubr.msk.bf16.gmra.mrb[4].mxu1 %vm177_vm0, %v2193_v14  ;;  %vm3408_vm6 = vcmp.ne.s32.totalorder %v2406_v31, %v2392_v26  ;;  %vm3407_vm9 = vcmp.ne.s32.totalorder %v2434_v41, %v2392_v26  ;;  %31 = vst.msk [vmem:[#allocation2 + $0x38] sm:$0xff] %vm3404_vm10, %v2289_v50  ;;  %32 = vst.msk [vmem:[#allocation2 + $0x40] sm:$0xff] %vm3404_vm10, %v2289_v50 }
  0x13   :  { %33 = vst.msk [vmem:[#allocation2 + $0x48] sm:$0xff] %vm3404_vm10, %v2289_v50  ;;  %34 = vst.msk [vmem:[#allocation2 + $0x50] sm:$0xff] %vm3404_vm10, %v2289_v50 }
  0x14   :  { %414 = vperm.xlu1 %2183, %v92_v16   ;;  %35 = vst.msk [vmem:[#allocation2 + $0x58] sm:$0xff] %vm3404_vm10, %v2289_v50  ;;  %36 = vst.msk [vmem:[#allocation2 + $0x60] sm:$0xff] %vm3404_vm10, %v2289_v50 }
  0x15   :  { %37 = vst.msk [vmem:[#allocation2 + $0x68] sm:$0xff] %vm3404_vm10, %v2289_v50  ;;  %38 = vst.msk [vmem:[#allocation2 + $0x70] sm:$0xff] %vm3404_vm10, %v2289_v50  ;;  %v2653_v12 = vld [vmem:[#allocation2 + $0x10] sm:$0xff] }
  0x16   :  { %39 = vst.msk [vmem:[#allocation2 + $0x78] sm:$0xff] %vm3404_vm10, %v2289_v50  ;;  %41 = vst.msk [vmem:[#allocation3 + $0x8] sm:$0xff] %vm3404_vm10, %v3386_v43  ;;  %v2655_v13 = vld [vmem:[#allocation2] sm:$0xff] }
  0x17   :  { %42 = vst.msk [vmem:[#allocation3 + $0x10] sm:$0xff] %vm3404_vm10, %v3386_v43  ;;  %43 = vst.msk [vmem:[#allocation3 + $0x18] sm:$0xff] %vm3404_vm10, %v3386_v43 }
  0x18   :  { %417 = vperm.xlu1 %2183, %v93_v17   ;;  %44 = vst.msk [vmem:[#allocation3 + $0x20] sm:$0xff] %vm3404_vm10, %v3386_v43  ;;  %45 = vst.msk [vmem:[#allocation3 + $0x28] sm:$0xff] %vm3404_vm10, %v3386_v43 }
  0x19   :  { %46 = vst.msk [vmem:[#allocation3 + $0x30] sm:$0xff] %vm3404_vm10, %v3386_v43  ;;  %47 = vst.msk [vmem:[#allocation3 + $0x38] sm:$0xff] %vm3404_vm10, %v3386_v43 }
  0x1a   :  { %48 = vst.msk [vmem:[#allocation3 + $0x40] sm:$0xff] %vm3404_vm10, %v3386_v43  ;;  %49 = vst.msk [vmem:[#allocation3 + $0x48] sm:$0xff] %vm3404_vm10, %v3386_v43 }
  0x1b   :  { %50 = vst.msk [vmem:[#allocation3 + $0x50] sm:$0xff] %vm3404_vm10, %v3386_v43  ;;  %51 = vst.msk [vmem:[#allocation3 + $0x58] sm:$0xff] %vm3404_vm10, %v3386_v43 }
  0x1c   :  { %420 = vperm.xlu1 %2183, %v94_v18   ;;  %52 = vst.msk [vmem:[#allocation3 + $0x60] sm:$0xff] %vm3404_vm10, %v3386_v43  ;;  %53 = vst.msk [vmem:[#allocation3 + $0x68] sm:$0xff] %vm3404_vm10, %v3386_v43 }
  0x1d   :  { %54 = vst.msk [vmem:[#allocation3 + $0x70] sm:$0xff] %vm3404_vm10, %v3386_v43  ;;  %55 = vst.msk [vmem:[#allocation3 + $0x78] sm:$0xff] %vm3404_vm10, %v3386_v43 }
  0x1e   :  { %56 = vst.msk [vmem:[#allocation4] sm:$0xff] %vm3404_vm10, %v3386_v43  ;;  %57 = vst.msk [vmem:[#allocation4 + $0x8] sm:$0xff] %vm3404_vm10, %v3386_v43 }
  0x1f   :  { %58 = vst.msk [vmem:[#allocation4 + $0x10] sm:$0xff] %vm3404_vm10, %v3386_v43  ;;  %59 = vst.msk [vmem:[#allocation4 + $0x18] sm:$0xff] %vm3404_vm10, %v3386_v43 }
  0x20   :  { %423 = vperm.xlu1 %2183, %v95_v19   ;;  %60 = vst.msk [vmem:[#allocation4 + $0x20] sm:$0xff] %vm3404_vm10, %v3386_v43  ;;  %61 = vst.msk [vmem:[#allocation4 + $0x28] sm:$0xff] %vm3404_vm10, %v3386_v43 }
  0x21   :  { %62 = vst.msk [vmem:[#allocation4 + $0x30] sm:$0xff] %vm3404_vm10, %v3386_v43  ;;  %63 = vst.msk [vmem:[#allocation4 + $0x38] sm:$0xff] %vm3404_vm10, %v3386_v43 }
  0x22   :  { %64 = vst.msk [vmem:[#allocation4 + $0x40] sm:$0xff] %vm3404_vm10, %v3386_v43  ;;  %65 = vst.msk [vmem:[#allocation4 + $0x48] sm:$0xff] %vm3404_vm10, %v3386_v43 }
  0x23   :  { %66 = vst.msk [vmem:[#allocation4 + $0x50] sm:$0xff] %vm3404_vm10, %v3386_v43  ;;  %67 = vst.msk [vmem:[#allocation4 + $0x58] sm:$0xff] %vm3404_vm10, %v3386_v43 }
  0x24   :  { %68 = vst.msk [vmem:[#allocation4 + $0x60] sm:$0xff] %vm3404_vm10, %v3386_v43  ;;  %69 = vst.msk [vmem:[#allocation4 + $0x68] sm:$0xff] %vm3404_vm10, %v3386_v43 }
  0x25   :  { %70 = vst.msk [vmem:[#allocation4 + $0x70] sm:$0xff] %vm3404_vm10, %v3386_v43  ;;  %71 = vst.msk [vmem:[#allocation4 + $0x78] sm:$0xff] %vm3404_vm10, %v3386_v43 }
  0x26   :  { %72 = vst.msk [vmem:[#allocation5] sm:$0xff] %vm3404_vm10, %v3386_v43  ;;  %73 = vst.msk [vmem:[#allocation5 + $0x8] sm:$0xff] %vm3404_vm10, %v3386_v43 }
  0x27   :  { %74 = vst.msk [vmem:[#allocation5 + $0x10] sm:$0xff] %vm3404_vm10, %v3386_v43  ;;  %75 = vst.msk [vmem:[#allocation5 + $0x18] sm:$0xff] %vm3404_vm10, %v3386_v43 }
  0x28   :  { %76 = vst.msk [vmem:[#allocation5 + $0x20] sm:$0xff] %vm3404_vm10, %v3386_v43  ;;  %77 = vst.msk [vmem:[#allocation5 + $0x28] sm:$0xff] %vm3404_vm10, %v3386_v43 }
  0x29   :  { %78 = vst.msk [vmem:[#allocation5 + $0x30] sm:$0xff] %vm3404_vm10, %v3386_v43  ;;  %79 = vst.msk [vmem:[#allocation5 + $0x38] sm:$0xff] %vm3404_vm10, %v3386_v43 }
  0x2a   :  { %80 = vst.msk [vmem:[#allocation5 + $0x40] sm:$0xff] %vm3404_vm10, %v3386_v43  ;;  %81 = vst.msk [vmem:[#allocation5 + $0x48] sm:$0xff] %vm3404_vm10, %v3386_v43 }
  0x2b   :  { %82 = vst.msk [vmem:[#allocation5 + $0x50] sm:$0xff] %vm3404_vm10, %v3386_v43  ;;  %83 = vst.msk [vmem:[#allocation5 + $0x58] sm:$0xff] %vm3404_vm10, %v3386_v43 }
  0x2c   :  { %84 = vst.msk [vmem:[#allocation5 + $0x60] sm:$0xff] %vm3404_vm10, %v3386_v43  ;;  %85 = vst.msk [vmem:[#allocation5 + $0x68] sm:$0xff] %vm3404_vm10, %v3386_v43 }
  0x2d   :  { %86 = vst.msk [vmem:[#allocation5 + $0x70] sm:$0xff] %vm3404_vm10, %v3386_v43  ;;  %87 = vst.msk [vmem:[#allocation5 + $0x78] sm:$0xff] %vm3404_vm10, %v3386_v43  ;;  %v1581_v18 = vld [vmem:[#allocation5] sm:$0xff] }
  0x2e   :  { %vm385_vm15 = vmand %vm367_vm3, %vm3413_vm1 }
  0x85   :  { %v2382_v20 = vpop.permute.xlu1 %405  ;;  %v403_v28 = vpop.permute.xlu0 %402 }
  0x86   :  { %vm453_vm2 = vcmp.eq.s32.totalorder %v403_v28, %v2397_v27 }
  0x87   :  { %vm2427_vm4 = vmand %vm453_vm2, %vm367_vm3 }
  0x88   :  { %v2110_v44 = vsel %vm2427_vm4, 1.0, %v3386_v43  ;;  %v103_v43 = vld [vmem:[%s3381_s0 + $0x78] sm:$0xff] }
  0x8b   :  { %v2384_v21 = vpop.permute.xlu1 %408  ;;  %v2651_v11 = vpop.permute.xlu0 %438 }
  0x8f   :  { %v2386_v22 = vpop.permute.xlu1 %411 }
  0x93   :  { %v2388_v23 = vpop.permute.xlu1 %414 }
  0x97   :  { %v2390_v25 = vpop.permute.xlu1 %417 }
  0x98   :  { %vm458_vm7 = vcmp.eq.s32.totalorder %v2390_v25, %v2397_v27  ;;  %v2671_v25 = vadd.s32 112, %v2399_v29 }
  0x99   :  { %vm2591_vm11 = vmand %vm458_vm7, %vm3407_vm9  ;;  %vm454_vm7 = vcmp.eq.s32.totalorder %v2382_v20, %v2397_v27 }
  0x9a   :  { %vm3405_vm12 = vcmp.ne.s32.totalorder %v2671_v25, %v2392_v26 }
  0x9b   :  { %v421_v30 = vpop.permute.xlu1 %420 }
  0x9c   :  { %vm459_vm5 = vcmp.eq.s32.totalorder %v421_v30, %v2397_v27  ;;  %v2673_v30 = vld [vmem:[#allocation2 + $0x58] sm:$0xff] }
  0x9d   :  { %vm2451_vm8 = vmand %vm459_vm5, %vm3408_vm6  ;;  %vm455_vm5 = vcmp.eq.s32.totalorder %v2384_v21, %v2397_v27  ;;  %v2895_v21 = vadd.s32 24, %v2399_v29 }
  0x9f   :  { %v2649_v10 = vpop.permute.xlu1 %423 }
  0xa0   :  { %vm460_vm9 = vcmp.eq.s32.totalorder %v2649_v10, %v2397_v27 }
  0xdd   :  { %v2408_v32 = vpop.f32.mrb[0].mxu0  ;;  %v2410_v33 = vpop.f32.mrb[0].mxu1 }
  0xde   :  { %v2412_v34 = vpop.f32.mrb[1].mxu0  ;;  %v487_v35 = vsel %vm3413_vm1, %v2408_v32, -inf  ;;  %v2417_v36 = vpop.f32.mrb[1].mxu1  ;;  %v495_v2 = vsel %vm3413_vm1, %v2410_v33, -inf }
  0xdf   :  { %v2419_v37 = vpop.f32.mrb[2].mxu0  ;;  %505 = vmax.xlane.f32.xlu1 %v487_v35  ;;  %v485_v38 = vsel %vm3413_vm1, %v2412_v34, -inf  ;;  %v2431_v40 = vpop.f32.mrb[2].mxu1  ;;  %v493_v3 = vsel %vm3413_vm1, %v2417_v36, -inf }
  0xe0   :  { %v2436_v42 = vpop.f32.mrb[3].mxu0  ;;  %501 = vmax.xlane.f32.xlu0 %v485_v38  ;;  %v2441_v45 = vpop.f32.mrb[3].mxu1  ;;  %v2460_v47 = vsel %vm3413_vm1, %v2431_v40, -inf  ;;  %v488_v4 = vsel %vm3413_vm1, %v2419_v37, -inf }
  0xe1   :  { %v494_v57 = vsel %vm3413_vm1, %v2441_v45, -inf  ;;  %v486_v5 = vsel %vm3413_vm1, %v2436_v42, -inf }
  0xe3   :  { %821 = vadd.xlane.f32.xlu1 %v2110_v44 }
  0xe5   :  { %v2462_v48 = vpop.f32.mrb[4].mxu0  ;;  %v2464_v49 = vpop.f32.mrb[4].mxu1 }
  0xe6   :  { %v2578_v51 = vpop.f32.mrb[5].mxu0  ;;  %v2580_v52 = vpop.f32.mrb[5].mxu1  ;;  %v491_v6 = vsel %vm3413_vm1, %v2462_v48, -inf  ;;  %v499_v7 = vsel %vm3413_vm1, %v2464_v49, -inf }
  0xe7   :  { %523 = vmax.xlane.f32.xlu1 %v2460_v47  ;;  %v2596_v55 = vpop.f32.mrb[6].mxu0  ;;  %v2598_v56 = vpop.f32.mrb[6].mxu1  ;;  %v489_v8 = vsel %vm3413_vm1, %v2578_v51, -inf  ;;  %v497_v9 = vsel %vm3413_vm1, %v2580_v52, -inf  ;;  %v2682_v47 = vld [vmem:[#allocation2 + $0x48] sm:$0xff] }
  0xe8   :  { %v2603_v58 = vpop.f32.mrb[7].mxu0  ;;  %v2605_v59 = vpop.f32.mrb[7].mxu1  ;;  %v492_v61 = vsel %vm3413_vm1, %v2596_v55, -inf  ;;  %v500_v62 = vsel %vm3413_vm1, %v2598_v56, -inf  ;;  %3432 = vst [vmem:[#allocation9_spill] sm:$0xff] %v2682_v47 }
  0xe9   :  { %v490_v0 = vsel %vm3413_vm1, %v2603_v58, -inf  ;;  %v498_v1 = vsel %vm3413_vm1, %v2605_v59, -inf }
  0xeb   :  { %519 = vmax.xlane.f32.xlu1 %v494_v57 }
  0xef   :  { %515 = vmax.xlane.f32.xlu1 %v492_v61 }
  0xf3   :  { %531 = vmax.xlane.f32.xlu1 %v500_v62 }
  0xf6   :  { %444 = vperm.xlu0 %2182, %v102_v63  }
  0xf7   :  { %511 = vmax.xlane.f32.xlu1 %v490_v0  ;;  %v2701_v0 = vld [vmem:[#allocation2 + $0x38] sm:$0xff] }
  0xf8   :  { %3436 = vst [vmem:[#allocation11_spill] sm:$0xff] %v2701_v0 }
  0xfb   :  { %527 = vmax.xlane.f32.xlu1 %v498_v1 }
 0x115   :  { %521 = vmax.xlane.f32.xlu0 %v495_v2 }
 0x119   :  { %517 = vmax.xlane.f32.xlu0 %v493_v3 }
 0x11d   :  { %507 = vmax.xlane.f32.xlu0 %v488_v4  ;;  %v2710_v4 = vld [vmem:[#allocation2 + $0x78] sm:$0xff] }
 0x11e   :  { %3438 = vst [vmem:[#allocation13_spill] sm:$0xff] %v2710_v4 }
 0x121   :  { %503 = vmax.xlane.f32.xlu0 %v486_v5 }
 0x125   :  { %513 = vmax.xlane.f32.xlu0 %v491_v6 }
 0x129   :  { %529 = vmax.xlane.f32.xlu0 %v499_v7  ;;  %v2717_v7 = vld [vmem:[#allocation2 + $0x28] sm:$0xff] }
 0x12a   :  { %3440 = vst [vmem:[#allocation15_spill] sm:$0xff] %v2717_v7 }
 0x12d   :  { %509 = vmax.xlane.f32.xlu0 %v489_v8 }
 0x131   :  { %525 = vmax.xlane.f32.xlu0 %v497_v9 }
 0x16c   :  { %v506_v14 = vpop.xlane.xlu1 %505 }
 0x16d   :  { %v2658_v15 = vmax.f32 %v2653_v12, %v506_v14  ;;  %v502_v16 = vpop.xlane.xlu0 %501  ;;  %v2724_v14 = vld [vmem:[#allocation2 + $0x68] sm:$0xff] }
 0x16e   :  { %v2661_v17 = vmax.f32 %v2655_v13, %v502_v16  ;;  %3442 = vst [vmem:[#allocation17_spill] sm:$0xff] %v2724_v14 }
 0x16f   :  { %1519 = vst.msk [vmem:[#allocation2 + $0x10] sm:$0xff] %vm3404_vm10, %v2658_v15 }
 0x170   :  { %1517 = vst.msk [vmem:[#allocation2] sm:$0xff] %vm3404_vm10, %v2661_v17  ;;  %551 = vperm.xlu1 %2183, %v2661_v17   ;;  %v822_v24 = vpop.xlane.xlu1 %821 }
 0x171   :  { %v1597_v28 = vadd.f32 %v1581_v18, %v822_v24  ;;  %v741_v24 = vsel %vm2427_vm4, %v2412_v34, 0.0 }
 0x173   :  { %1613 = vst.msk [vmem:[#allocation5] sm:$0xff] %vm3404_vm10, %v1597_v28  ;;  %v2736_v28 = vld [vmem:[#allocation2 + $0x50] sm:$0xff] }
 0x174   :  { %v524_v35 = vpop.xlane.xlu1 %523 }
 0x175   :  { %v445_v38 = vpop.permute.xlu0 %444  ;;  %v2679_v44 = vmax.f32 %v2673_v30, %v524_v35 }
 0x176   :  { %vm467_vm13 = vcmp.eq.s32.totalorder %v445_v38, %v2397_v27  ;;  %v96_v38 = vld [vmem:[%s3381_s0 + $0x40] sm:$0xff] }
 0x177   :  { %1528 = vst.msk [vmem:[#allocation2 + $0x58] sm:$0xff] %vm3404_vm10, %v2679_v44  ;;  %vm2691_vm14 = vmand %vm467_vm13, %vm3405_vm12  ;;  %vm3411_vm12 = vcmp.ne.s32.totalorder %v2895_v21, %v2392_v26 }
 0x178   :  { %v520_v61 = vpop.xlane.xlu1 %519 }
 0x179   :  { %v2699_v63 = vmax.f32 %v2682_v47, %v520_v61 }
 0x17b   :  { %3435 = vst [vmem:[#allocation10_spill] sm:$0xff] %v2699_v63  ;;  %1526 = vst.msk [vmem:[#allocation2 + $0x48] sm:$0xff] %vm3404_vm10, %v2699_v63 }
 0x17c   :  { %v516_v2 = vpop.xlane.xlu1 %515 }
 0x17d   :  { %v2708_v3 = vmax.f32 %v2701_v0, %v516_v2  ;;  %v2744_v2 = vld [vmem:[#allocation2 + $0x40] sm:$0xff] }
 0x17e   :  { %3444 = vst [vmem:[#allocation19_spill] sm:$0xff] %v2744_v2 }
 0x17f   :  { %3437 = vst [vmem:[#allocation12_spill] sm:$0xff] %v2708_v3  ;;  %1524 = vst.msk [vmem:[#allocation2 + $0x38] sm:$0xff] %vm3404_vm10, %v2708_v3 }
 0x180   :  { %v532_v5 = vpop.xlane.xlu1 %531 }
 0x181   :  { %v2715_v6 = vmax.f32 %v2710_v4, %v532_v5  ;;  %v2768_v5 = vld [vmem:[#allocation2 + $0x8] sm:$0xff] }
 0x182   :  { %3446 = vst [vmem:[#allocation21_spill] sm:$0xff] %v2768_v5 }
 0x183   :  { %3439 = vst [vmem:[#allocation14_spill] sm:$0xff] %v2715_v6  ;;  %1532 = vst.msk [vmem:[#allocation2 + $0x78] sm:$0xff] %vm3404_vm10, %v2715_v6 }
 0x184   :  { %v512_v8 = vpop.xlane.xlu1 %511 }
 0x185   :  { %v2722_v9 = vmax.f32 %v2717_v7, %v512_v8  ;;  %v97_v8 = vld [vmem:[%s3381_s0 + $0x48] sm:$0xff] }
 0x187   :  { %3441 = vst [vmem:[#allocation16_spill] sm:$0xff] %v2722_v9  ;;  %1522 = vst.msk [vmem:[#allocation2 + $0x28] sm:$0xff] %vm3404_vm10, %v2722_v9 }
 0x188   :  { %v528_v16 = vpop.xlane.xlu1 %527 }
 0x189   :  { %v2729_v18 = vmax.f32 %v2724_v14, %v528_v16 }
 0x18b   :  { %3443 = vst [vmem:[#allocation18_spill] sm:$0xff] %v2729_v18  ;;  %1530 = vst.msk [vmem:[#allocation2 + $0x68] sm:$0xff] %vm3404_vm10, %v2729_v18 }
 0x194   :  { %757 = vadd.xlane.f32.xlu1 %v741_v24  ;;  %v2756_v24 = vld [vmem:[#allocation2 + $0x18] sm:$0xff] }
 0x1a2   :  { %v522_v35 = vpop.xlane.xlu0 %521 }
 0x1a3   :  { %v2742_v61 = vmax.f32 %v2736_v28, %v522_v35  ;;  %v99_v35 = vld [vmem:[%s3381_s0 + $0x58] sm:$0xff] }
 0x1a5   :  { %1527 = vst.msk [vmem:[#allocation2 + $0x50] sm:$0xff] %vm3404_vm10, %v2742_v61  ;;  %426 = vperm.xlu1 %2183, %v96_v38   ;;  %v98_v38 = vld [vmem:[%s3381_s0 + $0x50] sm:$0xff] }
 0x1a6   :  { %v518_v39 = vpop.xlane.xlu0 %517 }
 0x1a7   :  { %v2754_v16 = vmax.f32 %v2744_v2, %v518_v39  ;;  %v101_v39 = vld [vmem:[%s3381_s0 + $0x68] sm:$0xff]  ;;  %v3042_v2 = vadd.s32 120, %v2399_v29 }
 0x1a9   :  { %3445 = vst [vmem:[#allocation20_spill] sm:$0xff] %v2754_v16  ;;  %1525 = vst.msk [vmem:[#allocation2 + $0x40] sm:$0xff] %vm3404_vm10, %v2754_v16  ;;  %429 = vperm.xlu1 %2183, %v97_v8  }
 0x1aa   :  { %v508_v1 = vpop.xlane.xlu0 %507 }
 0x1ab   :  { %v2766_v50 = vmax.f32 %v2756_v24, %v508_v1  ;;  %v2781_v1 = vld [vmem:[#allocation2 + $0x30] sm:$0xff] }
 0x1ac   :  { %3448 = vst [vmem:[#allocation23_spill] sm:$0xff] %v2781_v1 }
 0x1ad   :  { %1520 = vst.msk [vmem:[#allocation2 + $0x18] sm:$0xff] %vm3404_vm10, %v2766_v50  ;;  %566 = vperm.xlu0 %2182, %v2766_v50   ;;  %432 = vperm.xlu1 %2183, %v98_v38  }
 0x1ae   :  { %v504_v8 = vpop.xlane.xlu0 %503 }
 0x1af   :  { %v2779_v19 = vmax.f32 %v2768_v5, %v504_v8  ;;  %v2794_v8 = vld [vmem:[#allocation2 + $0x70] sm:$0xff] }
 0x1b0   :  { %3450 = vst [vmem:[#allocation25_spill] sm:$0xff] %v2794_v8 }
 0x1b1   :  { %3447 = vst [vmem:[#allocation22_spill] sm:$0xff] %v2779_v19  ;;  %1518 = vst.msk [vmem:[#allocation2 + $0x8] sm:$0xff] %vm3404_vm10, %v2779_v19  ;;  %606 = vperm.xlu0 %2182, %v2679_v44   ;;  %435 = vperm.xlu1 %2183, %v99_v35  }
 0x1b2   :  { %v514_v38 = vpop.xlane.xlu0 %513 }
 0x1b3   :  { %v2792_v62 = vmax.f32 %v2781_v1, %v514_v38  ;;  %v2807_v38 = vld [vmem:[#allocation2 + $0x20] sm:$0xff] }
 0x1b4   :  { %3452 = vst [vmem:[#allocation27_spill] sm:$0xff] %v2807_v38  ;;  %v2817_v1 = vld [vmem:[#allocation2 + $0x60] sm:$0xff] }
 0x1b5   :  { %3449 = vst [vmem:[#allocation24_spill] sm:$0xff] %v2792_v62  ;;  %1523 = vst.msk [vmem:[#allocation2 + $0x30] sm:$0xff] %vm3404_vm10, %v2792_v62  ;;  %556 = vperm.xlu0 %2182, %v2779_v19   ;;  %441 = vperm.xlu1 %2183, %v101_v39  }
 0x1b6   :  { %v530_v35 = vpop.xlane.xlu0 %529  ;;  %3454 = vst [vmem:[#allocation29_spill] sm:$0xff] %v2817_v1 }
 0x1b7   :  { %v2805_v53 = vmax.f32 %v2794_v8, %v530_v35 }
 0x1b9   :  { %3451 = vst [vmem:[#allocation26_spill] sm:$0xff] %v2805_v53  ;;  %1531 = vst.msk [vmem:[#allocation2 + $0x70] sm:$0xff] %vm3404_vm10, %v2805_v53  ;;  %596 = vperm.xlu0 %2182, %v2699_v63   ;;  %447 = vperm.xlu1 %2183, %v103_v43   ;;  %v3481_v63 = vmov 0.0  }
 0x1ba   :  { %v510_v39 = vpop.xlane.xlu0 %509 }
 0x1bb   :  { %v2815_v60 = vmax.f32 %v2807_v38, %v510_v39  ;;  %v1533_v38 = vld [vmem:[#allocation4] sm:$0xff] }
 0x1bd   :  { %3453 = vst [vmem:[#allocation28_spill] sm:$0xff] %v2815_v60  ;;  %1521 = vst.msk [vmem:[#allocation2 + $0x20] sm:$0xff] %vm3404_vm10, %v2815_v60  ;;  %571 = vperm.xlu0 %2182, %v2815_v60   ;;  %561 = vperm.xlu1 %2183, %v2658_v15  }
 0x1be   :  { %v526_v14 = vpop.xlane.xlu0 %525 }
 0x1bf   :  { %v2826_v8 = vmax.f32 %v2817_v1, %v526_v14 }
 0x1c1   :  { %3455 = vst [vmem:[#allocation30_spill] sm:$0xff] %v2826_v8  ;;  %586 = vperm.xlu0 %2182, %v2708_v3   ;;  %601 = vperm.xlu1 %2183, %v2742_v61   ;;  %1529 = vst.msk [vmem:[#allocation2 + $0x60] sm:$0xff] %vm3404_vm10, %v2826_v8 }
 0x1c5   :  { %626 = vperm.xlu0 %2182, %v2715_v6   ;;  %591 = vperm.xlu1 %2183, %v2754_v16   ;;  %v2873_v6 = vadd.s32 8, %v2399_v29 }
 0x1c9   :  { %576 = vperm.xlu0 %2182, %v2722_v9   ;;  %581 = vperm.xlu1 %2183, %v2792_v62  }
 0x1cd   :  { %616 = vperm.xlu0 %2182, %v2729_v18   ;;  %621 = vperm.xlu1 %2183, %v2805_v53  }
 0x1d1   :  { %611 = vperm.xlu1 %2183, %v2826_v8  }
 0x1ef   :  { %v552_v14 = vpop.permute.xlu1 %551 }
 0x1f0   :  { %v629_v39 = vsub.f32 %v2412_v34, %v552_v14 }
 0x1f2   :  { %v645_v43 = vmul.f32 14.285714, %v629_v39 }
 0x1f4   :  { %v661_v35 = vsel %vm385_vm15, %v645_v43, -inf  ;;  %vm3409_vm15 = vcmp.ne.s32.totalorder %v2873_v6, %v2392_v26 }
 0x1f5   :  { %v677_v1 = vmul.f32 1.442695, %v661_v35 }
 0x1f7   :  { %2194 = vpow2.f32 %v677_v1  ;;  %v331_v1 = vadd.s32 16, %v2399_v29 }
 0x1f9   :  { %vm369_vm0 = vcmp.ne.s32.totalorder %v331_v1, %v2392_v26 }
 0x1fa   :  { %vm387_vm2 = vmand %vm369_vm0, %vm3413_vm1 }
 0x1fb   :  { %vm2884_vm13 = vmand %vm455_vm5, %vm369_vm0 }
 0x1fc   :  { %vm2903_vm0 = vmand %vm454_vm7, %vm3409_vm15 }
 0x201   :  { %v2195_v60 = vpop.eup %2194 }
 0x202   :  { %709 = vadd.xlane.f32.xlu1 %v2195_v60 }
 0x221   :  { %v758_v18 = vpop.xlane.xlu1 %757 }
 0x222   :  { %v1549_v53 = vadd.f32 %v1533_v38, %v758_v18 }
 0x224   :  { %1565 = vst.msk [vmem:[#allocation4] sm:$0xff] %vm3404_vm10, %v1549_v53  ;;  %v339_v53 = vadd.s32 80, %v2399_v29  ;;  %vm456_vm10 = vcmp.eq.s32.totalorder %v2386_v22, %v2397_v27 }
 0x225   :  { %v427_v8 = vpop.permute.xlu1 %426  ;;  %vm2932_vm7 = vmand %vm456_vm10, %vm3411_vm12 }
 0x226   :  { %vm377_vm3 = vcmp.ne.s32.totalorder %v339_v53, %v2392_v26 }
 0x227   :  { %vm395_vm4 = vmand %vm377_vm3, %vm3413_vm1 }
 0x229   :  { %v2848_v62 = vpop.permute.xlu1 %429 }
 0x22d   :  { %v2850_v34 = vpop.permute.xlu1 %432 }
 0x22e   :  { %vm463_vm15 = vcmp.eq.s32.totalorder %v2850_v34, %v2397_v27  ;;  %v3469_v34 = vsel %vm2591_vm11, %v2603_v58, 0.0 }
 0x22f   :  { %vm2986_vm12 = vmand %vm463_vm15, %vm377_vm3 }
 0x230   :  { %v751_v53 = vsel %vm2986_vm12, %v2410_v33, 0.0 }
 0x231   :  { %v2852_v14 = vpop.permute.xlu1 %435 }
 0x235   :  { %v2854_v7 = vpop.permute.xlu1 %441 }
 0x239   :  { %v2856_v39 = vpop.permute.xlu1 %447 }
 0x23d   :  { %v562_v35 = vpop.permute.xlu1 %561 }
 0x23e   :  { %v631_v60 = vsub.f32 %v2408_v32, %v562_v35 }
 0x240   :  { %v647_v18 = vmul.f32 14.285714, %v631_v60  ;;  %v2878_v60 = vadd.s32 32, %v2399_v29 }
 0x241   :  { %v602_v38 = vpop.permute.xlu1 %601 }
 0x242   :  { %v663_v43 = vsel %vm387_vm2, %v647_v18, -inf  ;;  %v639_v9 = vsub.f32 %v2410_v33, %v602_v38  ;;  %vm457_vm2 = vcmp.eq.s32.totalorder %v2388_v23, %v2397_v27  ;;  %v742_v38 = vsel %vm2903_vm0, %v2436_v42, 0.0 }
 0x243   :  { %v681_v19 = vmul.f32 1.442695, %v663_v43  ;;  %v2937_v43 = vadd.s32 56, %v2399_v29  ;;  %v3023_v33 = vadd.s32 104, %v2399_v29 }
 0x244   :  { %v655_v35 = vmul.f32 14.285714, %v639_v9  ;;  %v2113_v9 = vsel %vm2932_vm7, 1.0, %v3481_v63 }
 0x245   :  { %2196 = vpow2.f32 %v681_v19  ;;  %vm3412_vm6 = vcmp.ne.s32.totalorder %v2937_v43, %v2392_v26  ;;  %v592_v3 = vpop.permute.xlu1 %591 }
 0x246   :  { %v671_v5 = vsel %vm395_vm4, %v655_v35, -inf  ;;  %vm3406_vm4 = vcmp.ne.s32.totalorder %v2878_v60, %v2392_v26  ;;  %v744_v35 = vsel %vm2932_vm7, %v2419_v37, 0.0 }
 0x247   :  { %v697_v4 = vmul.f32 1.442695, %v671_v5  ;;  %vm2910_vm5 = vmand %vm457_vm2, %vm3406_vm4  ;;  %v2921_v5 = vpop.permute.xlu0 %566  ;;  %vm461_vm2 = vcmp.eq.s32.totalorder %v427_v8, %v2397_v27  ;;  %v3465_v8 = vmov 0 }
 0x248   :  { %v745_v1 = vsel %vm2910_vm5, %v2578_v51, 0.0 }
 0x249   :  { %2198 = vpow2.f32 %v697_v4  ;;  %v743_v4 = vsel %vm2884_vm13, %v2408_v32, 0.0  ;;  %v2919_v32 = vadd.s32 64, %v2399_v29  ;;  %v582_v19 = vpop.permute.xlu1 %581 }
 0x24b   :  { %vm3410_vm4 = vcmp.ne.s32.totalorder %v2919_v32, %v2392_v26  ;;  %v607_v10 = vpop.permute.xlu0 %606 }
 0x24c   :  { %vm2954_vm10 = vmand %vm461_vm2, %vm3410_vm4  ;;  %vm465_vm4 = vcmp.eq.s32.totalorder %v2651_v11, %v2397_v27  ;;  %v340_v11 = vadd.s32 88, %v2399_v29 }
 0x24d   :  { %v3466_v8 = vsel %vm2954_vm10, 4294967295, %v3465_v8  ;;  %vm2974_vm2 = vmand %vm460_vm9, %vm3412_vm6  ;;  %vm462_vm6 = vcmp.eq.s32.totalorder %v2848_v62, %v2397_v27  ;;  %v1390_v62 = vsub.f32 %v2653_v12, %v2658_v15 }
 0x24e   :  { %vm3490_vm7 = vcmp.ne.s32.totalorder %v340_v11, %v2392_v26 }
 0x24f   :  { %v2197_v18 = vpop.eup %2196 }
 0x250   :  { %713 = vadd.xlane.f32.xlu0 %v2197_v18  ;;  %v3464_v18 = vsel %vm2451_vm8, %v2462_v48, 0.0 }
 0x253   :  { %v2199_v20 = vpop.eup %2198 }
 0x254   :  { %761 = vadd.xlane.f32.xlu0 %v743_v4  ;;  %729 = vadd.xlane.f32.xlu1 %v2199_v20  ;;  %v2961_v20 = vadd.s32 96, %v2399_v29  ;;  %v2966_v4 = vadd.s32 72, %v2399_v29 }
 0x256   :  { %vm3417_vm9 = vcmp.ne.s32.totalorder %v2961_v20, %v2392_v26  ;;  %vm3419_vm1 = vcmp.ne.s32.totalorder %v2966_v4, %v2392_v26 }
 0x257   :  { %vm3008_vm3 = vmand %vm465_vm4, %vm3417_vm9  ;;  %vm466_vm4 = vcmp.eq.s32.totalorder %v2854_v7, %v2397_v27  ;;  %vm3425_vm9 = vcmp.ne.s32.totalorder %v3023_v33, %v2392_v26 }
 0x258   :  { %765 = vadd.xlane.f32.xlu0 %v745_v1  ;;  %759 = vadd.xlane.f32.xlu1 %v742_v38  ;;  %v749_v1 = vsel %vm2954_vm10, %v2417_v36, 0.0  ;;  %vm3015_vm15 = vmand %vm462_vm6, %vm3419_vm1  ;;  %vm3420_vm10 = vcmp.ne.s32.totalorder %v340_v11, %v2392_v26  ;;  %vm468_vm1 = vcmp.eq.s32.totalorder %v2856_v39, %v2397_v27  ;;  %v632_v39 = vsub.f32 %v2419_v37, %v2921_v5 }
 0x259   :  { %v2115_v5 = vsel %vm2591_vm11, 1.0, %v3481_v63 }
 0x25a   :  { %v648_v0 = vmul.f32 14.285714, %v632_v39  ;;  %v637_v39 = vsub.f32 %v2417_v36, %v592_v3  ;;  %v2114_v36 = vsel %vm2910_vm5, 1.0, %v3481_v63  ;;  %vm3494_vm5 = vcmp.ne.s32.totalorder %v2966_v4, %v2392_v26 }
 0x25b   :  { %v2116_v4 = vsel %vm2451_vm8, 1.0, %v3481_v63  ;;  %vm3502_vm8 = vcmp.ne.s32.totalorder %v2873_v6, %v2392_v26 }
 0x25c   :  { %769 = vadd.xlane.f32.xlu0 %v3464_v18  ;;  %763 = vadd.xlane.f32.xlu1 %v744_v35  ;;  %v3470_v35 = vmov 0  ;;  %v2997_v18 = vpop.permute.xlu0 %556  ;;  %v653_v38 = vmul.f32 14.285714, %v637_v39 }
 0x25d   :  { %v3471_v35 = vsel %vm2986_vm12, 4294967295, %v3470_v35  ;;  %vm464_vm12 = vcmp.eq.s32.totalorder %v2852_v14, %v2397_v27 }
 0x25e   :  { %vm3033_vm6 = vmand %vm464_vm12, %vm3420_vm10  ;;  %vm382_vm10 = vcmp.ne.s32.totalorder %v3042_v2, %v2392_v26 }
 0x25f   :  { %vm3054_vm12 = vmand %vm466_vm4, %vm3425_vm9  ;;  %v2121_v6 = vsel %vm3033_vm6, 1.0, %v3481_v63 }
 0x260   :  { %773 = vadd.xlane.f32.xlu0 %v749_v1  ;;  %767 = vadd.xlane.f32.xlu1 %v3469_v34  ;;  %v748_v1 = vsel %vm2974_vm2, %v2596_v55, 0.0  ;;  %v597_v14 = vpop.permute.xlu0 %596  ;;  %vm3073_vm4 = vmand %vm468_vm1, %vm382_vm10  ;;  %vm3484_vm1 = vcmp.lt.s32.totalorder %v2392_v26, 8  ;;  %v635_v34 = vsub.f32 %v2462_v48, %v582_v19 }
 0x261   :  { %v756_v47 = vsel %vm3073_vm4, %v2598_v56, 0.0  ;;  %vm3489_vm11 = vmmov %vm3484_vm1 }
 0x262   :  { %v651_v54 = vmul.f32 14.285714, %v635_v34 }
 0x264   :  { %777 = vadd.xlane.f32.xlu0 %v751_v53  ;;  %771 = vadd.xlane.f32.xlu1 %v748_v1  ;;  %v753_v53 = vsel %vm3008_vm3, %v2580_v52, 0.0  ;;  %v750_v1 = vsel %vm3015_vm15, %v2441_v45, 0.0  ;;  %v3062_v29 = vpop.permute.xlu0 %571 }
 0x268   :  { %781 = vadd.xlane.f32.xlu0 %v753_v53  ;;  %775 = vadd.xlane.f32.xlu1 %v750_v1  ;;  %v752_v53 = vsel %vm3033_vm6, %v2431_v40, 0.0  ;;  %v3478_v1 = vsel %vm2691_vm14, %v2464_v49, 0.0 }
 0x26c   :  { %785 = vadd.xlane.f32.xlu0 %v3478_v1  ;;  %779 = vadd.xlane.f32.xlu1 %v752_v53  ;;  %v2111_v1 = vsel %vm2903_vm0, 1.0, %v3481_v63  ;;  %v754_v53 = vsel %vm3054_vm12, %v2605_v59, 0.0  ;;  %vm3485_vm0 = vcmp.ne.s32.totalorder %v2895_v21, %v2392_v26  ;;  %v638_v21 = vsub.f32 %v2441_v45, %v597_v14 }
 0x26d   :  { %vm3091_vm9 = vmand %vm3485_vm0, %vm3484_vm1  ;;  %vm3498_vm0 = vcmp.ne.s32.totalorder %v2919_v32, %v2392_v26 }
 0x26e   :  { %vm3112_vm1 = vmand %vm3490_vm7, %vm3489_vm11  ;;  %v654_v3 = vmul.f32 14.285714, %v638_v21 }
 0x270   :  { %823 = vadd.xlane.f32.xlu0 %v2111_v1  ;;  %783 = vadd.xlane.f32.xlu1 %v754_v53  ;;  %v640_v1 = vsub.f32 %v2431_v40, %v607_v10  ;;  %v587_v53 = vpop.permute.xlu0 %586  ;;  %v2112_v40 = vsel %vm2884_vm13, 1.0, %v3481_v63  ;;  %vm3493_vm13 = vmmov %vm3489_vm11 }
 0x272   :  { %v656_v10 = vmul.f32 14.285714, %v640_v1  ;;  %v636_v1 = vsub.f32 %v2596_v55, %v587_v53  ;;  %v2119_v55 = vsel %vm3015_vm15, 1.0, %v3481_v63 }
 0x274   :  { %827 = vadd.xlane.f32.xlu0 %v2113_v9  ;;  %787 = vadd.xlane.f32.xlu1 %v756_v47  ;;  %v3488_v47 = vsub.f32 %v2655_v13, %v2661_v17  ;;  %v664_v9 = vsel %vm3091_vm9, %v648_v0, -inf  ;;  %v627_v13 = vpop.permute.xlu0 %626  ;;  %v2117_v17 = vsel %vm2974_vm2, 1.0, %v3481_v63  ;;  %v630_v0 = vsub.f32 %v2436_v42, %v2997_v18  ;;  %vm3132_vm2 = vmand %vm3494_vm5, %vm3493_vm13 }
 0x275   :  { %v683_v11 = vmul.f32 1.442695, %v664_v9  ;;  %v672_v14 = vsel %vm3112_vm1, %v656_v10, -inf  ;;  %vm3497_vm9 = vmmov %vm3489_vm11  ;;  %v644_v37 = vsub.f32 %v2598_v56, %v627_v13  ;;  %vm3506_vm13 = vcmp.ne.s32.totalorder %v2937_v43, %v2392_v26 }
 0x276   :  { %v1404_v22 = vmul.f32 14.285714, %v3488_v47  ;;  %vm3141_vm11 = vmand %vm3498_vm0, %vm3497_vm9  ;;  %v699_v18 = vmul.f32 1.442695, %v672_v14  ;;  %v646_v53 = vmul.f32 14.285714, %v630_v0  ;;  %v622_v47 = vpop.permute.xlu1 %621 }
 0x277   :  { %vm3501_vm15 = vmmov %vm3497_vm9  ;;  %v669_v56 = vsel %vm3141_vm11, %v653_v38, -inf  ;;  %v660_v21 = vmul.f32 14.285714, %v644_v37  ;;  %v643_v13 = vsub.f32 %v2464_v49, %v622_v47  ;;  %vm3514_vm11 = vcmp.ne.s32.totalorder %v2406_v31, %v2392_v26 }
 0x278   :  { %831 = vadd.xlane.f32.xlu0 %v2115_v5  ;;  %825 = vadd.xlane.f32.xlu1 %v2112_v40  ;;  %v1420_v45 = vmul.f32 1.442695, %v1404_v22  ;;  %v577_v32 = vpop.permute.xlu0 %576  ;;  %v670_v5 = vsel %vm3132_vm2, %v654_v3, -inf  ;;  %v652_v40 = vmul.f32 14.285714, %v636_v1  ;;  %vm3160_vm7 = vmand %vm3502_vm8, %vm3501_vm15  ;;  %vm3509_vm2 = vnez %v3466_v8 }
 0x279   :  { %vm3505_vm1 = vmmov %vm3497_vm9  ;;  %v2118_v22 = vsel %vm3509_vm2, 1.0, %v3481_v63  ;;  %v695_v10 = vmul.f32 1.442695, %v670_v5  ;;  %v634_v39 = vsub.f32 %v2603_v58, %v577_v32  ;;  %v662_v43 = vsel %vm3160_vm7, %v646_v53, -inf }
 0x27a   :  { %2200 = vpow2.f32 %v1420_v45  ;;  %vm3171_vm5 = vmand %vm3506_vm13, %vm3505_vm1  ;;  %v693_v9 = vmul.f32 1.442695, %v669_v56  ;;  %v679_v45 = vmul.f32 1.442695, %v662_v43  ;;  %vm3519_vm8 = vcmp.ne.s32.totalorder %v2434_v41, %v2392_v26  ;;  %v612_v14 = vpop.permute.xlu1 %611  ;;  %v1452_v41 = vld [vmem:[#allocation3] sm:$0xff] }
 0x27b   :  { %2202 = vpow2.f32 %v683_v11  ;;  %v668_v16 = vsel %vm3171_vm5, %v652_v40, -inf  ;;  %vm3510_vm6 = vmmov %vm3505_vm1  ;;  %v650_v31 = vmul.f32 14.285714, %v634_v39  ;;  %v659_v11 = vmul.f32 14.285714, %v643_v13 }
 0x27c   :  { %835 = vadd.xlane.f32.xlu0 %v2117_v17  ;;  %829 = vadd.xlane.f32.xlu1 %v2114_v36  ;;  %2204 = vpow2.f32 %v699_v18  ;;  %vm3192_vm9 = vmand %vm382_vm10, %vm3510_vm6  ;;  %v617_v58 = vpop.permute.xlu0 %616  ;;  %v2123_v17 = vsel %vm3054_vm12, 1.0, %v3481_v63  ;;  %vm3517_vm10 = vnez %v3471_v35  ;;  %v633_v36 = vsub.f32 %v2578_v51, %v3062_v29 }
 0x27d   :  { %vm3513_vm0 = vmmov %vm3505_vm1  ;;  %v2120_v2 = vsel %vm3517_vm10, 1.0, %v3481_v63  ;;  %2206 = vpow2.f32 %v695_v10  ;;  %v691_v0 = vmul.f32 1.442695, %v668_v16  ;;  %v676_v3 = vsel %vm3192_vm9, %v660_v21, -inf }
 0x27e   :  { %vm3201_vm15 = vmand %vm3514_vm11, %vm3513_vm0  ;;  %2208 = vpow2.f32 %v693_v9  ;;  %v642_v7 = vsub.f32 %v2605_v59, %v617_v58  ;;  %vm3523_vm13 = vcmp.ne.s32.totalorder %v2671_v25, %v2392_v26  ;;  %v2122_v1 = vsel %vm3008_vm3, 1.0, %v3481_v63 }
 0x27f   :  { %v667_v35 = vsel %vm3201_vm15, %v651_v54, -inf  ;;  %vm3518_vm12 = vmmov %vm3513_vm0  ;;  %2210 = vpow2.f32 %v679_v45  ;;  %v707_v38 = vmul.f32 1.442695, %v676_v3  ;;  %v649_v23 = vmul.f32 14.285714, %v633_v36  ;;  %v1760_v3 = vld [vmem:[#allocation4] sm:$0xff] }
 0x280   :  { %839 = vadd.xlane.f32.xlu0 %v2119_v55  ;;  %833 = vadd.xlane.f32.xlu1 %v2116_v4  ;;  %vm3223_vm7 = vmand %vm3519_vm8, %vm3518_vm12  ;;  %v689_v42 = vmul.f32 1.442695, %v667_v35  ;;  %2212 = vpow2.f32 %v691_v0  ;;  %v658_v4 = vmul.f32 14.285714, %v642_v7  ;;  %v641_v18 = vsub.f32 %v2580_v52, %v612_v14 }
 0x281   :  { %vm3522_vm1 = vmmov %vm3513_vm0  ;;  %v666_v55 = vsel %vm3223_vm7, %v650_v31, -inf  ;;  %vm3527_vm3 = vcmp.ne.s32.totalorder %v2878_v60, %v2392_v26  ;;  %v2124_v60 = vsel %vm2691_vm14, 1.0, %v3481_v63  ;;  %2214 = vpow2.f32 %v707_v38 }
 0x282   :  { %vm3232_vm5 = vmand %vm3523_vm13, %vm3522_vm1  ;;  %v687_v5 = vmul.f32 1.442695, %v666_v55  ;;  %2216 = vpow2.f32 %v689_v42  ;;  %v657_v56 = vmul.f32 14.285714, %v641_v18  ;;  %vm3534_vm15 = vcmask 7168  }
 0x283   :  { %vm3526_vm2 = vmmov %vm3513_vm0  ;;  %v675_v53 = vsel %vm3232_vm5, %v659_v11, -inf  ;;  %vm3536_vm10 = vcmp.ne.s32.totalorder %v2961_v20, %v2392_v26  ;;  %v1632_v20 = vld [vmem:[#allocation5] sm:$0xff]  ;;  %v2125_v45 = vsel %vm3073_vm4, 1.0, %v3481_v63  ;;  %v1776_v11 = vmul.f32 14.285714, %v1760_v3 }
 0x284   :  { %843 = vadd.xlane.f32.xlu0 %v2121_v6  ;;  %837 = vadd.xlane.f32.xlu1 %v2118_v22  ;;  %v2201_v19 = vpop.eup %2200  ;;  %vm3247_vm6 = vmand %vm3527_vm3, %vm3526_vm2  ;;  %v705_v46 = vmul.f32 1.442695, %v675_v53  ;;  %2218 = vpow2.f32 %v687_v5  ;;  %vm1922_vm7 = vcmp.gt.f32.partialorder %v1632_v20, 0.0  ;;  %v2290_v51 = vmov 1.0  }
 0x285   :  { %v2203_v29 = vpop.eup %2202  ;;  %v1468_v37 = vmul.f32 %v2201_v19, %v1452_v41  ;;  %vm3530_vm9 = vmmov %vm3513_vm0  ;;  %vm3531_vm0 = vcmp.ne.s32.totalorder %v3023_v33, %v2392_v26  ;;  %v665_v34 = vsel %vm3247_vm6, %v649_v23, -inf  ;;  %v1970_v49 = vsel %vm1922_vm7, %v1632_v20, 1.0  ;;  %v2262_v19 = vld [vmem:[%s3381_s0] sm:$0xff]  ;;  %s2291_s0 = smov [#allocation6]  }
 0x286   :  { %v2205_v25 = vpop.eup %2204  ;;  %vm3258_vm11 = vmand %vm3531_vm0, %vm3530_vm9  ;;  %v685_v57 = vmul.f32 1.442695, %v665_v34  ;;  %2220 = vpow2.f32 %v705_v46  ;;  %v1406_v53 = vmul.f32 14.285714, %v1390_v62  ;;  %v3538_v52 = vsub.f32 %v2736_v28, %v2742_v61  ;;  %v1537_v28 = vld [vmem:[#allocation4 + $0x20] sm:$0xff]  ;;  %v1534_v61 = vld [vmem:[#allocation4 + $0x8] sm:$0xff] }
 0x287   :  { %v2207_v33 = vpop.eup %2206  ;;  %v674_v47 = vsel %vm3258_vm11, %v658_v4, -inf  ;;  %vm3535_vm14 = vmmov %vm3522_vm1  ;;  %vm1840_vm1 = vcmp.eq.s32.totalorder %v2262_v19, 1  ;;  %s2084_s15 = sshll.u32 %s2291_s0, 4  ;;  %s2085_s15 = int_to_ptr.vmem [resolvable:$true] %s2084_s15 }
 0x288   :  { %847 = vadd.xlane.f32.xlu0 %v2123_v17  ;;  %841 = vadd.xlane.f32.xlu1 %v2120_v2  ;;  %v2209_v48 = vpop.eup %2208  ;;  %vm397_vm12 = vmand %vm3536_vm10, %vm3535_vm14  ;;  %v703_v6 = vmul.f32 1.442695, %v674_v47  ;;  %2222 = vpow2.f32 %v685_v57  ;;  %v1728_v17 = vld [vmem:[#allocation2] sm:$0xff]  ;;  %s2263_s16 = scalar_lea.vmem %s2085_s15, 128  ;;  %p2268_p1 = scmp.lt.s32.totalorder %s2085_s15, %s2085_s15 }
 0x289   :  { %v2211_v22 = vpop.eup %2210  ;;  %v673_v10 = vsel %vm397_vm12, %v657_v56, -inf  ;;  %v1744_v0 = vmul.f32 14.285714, %v1728_v17  ;;  %vm3537_vm4 = vmmov %vm3534_vm15  ;;  %v1462_v56 = vld [vmem:[#allocation3 + $0x50] sm:$0xff]  ;;  %p2264_p0 = scmp.ne.s32.totalorder %s2085_s15, %s2263_s16  ;;  %p2269_p2 = scmp.lt.s32.totalorder %s2263_s16, %s2263_s16 }
 0x28a   :  { %v2213_v21 = vpop.eup %2212  ;;  %v701_v39 = vmul.f32 1.442695, %v673_v10  ;;  %2224 = vpow2.f32 %v703_v6  ;;  %vm3539_vm13 = vmmov %vm3537_vm4 }
 0x28b   :  { %v2215_v9 = vpop.eup %2214  ;;  %vm3540_vm5 = vmmov %vm3537_vm4  ;;  %p2270_p3 = por %p2269_p2, %p2268_p1 }
 0x28c   :  { %715 = vadd.xlane.f32.xlu0 %v2203_v29  ;;  %845 = vadd.xlane.f32.xlu1 %v2122_v1  ;;  %v2217_v54 = vpop.eup %2216  ;;  %v1856_v29 = vsel %vm1840_vm1, 2.0, %v2290_v51  ;;  %vm3541_vm2 = vmmov %vm3537_vm4 }
 0x28d   :  { %vm3542_vm3 = vmmov %vm3541_vm2  ;;  %p2271_p4 = pnand %p2270_p3, %p2264_p0 }
 0x28e   :  { %v2219_v13 = vpop.eup %2218  ;;  %vm3543_vm6 = vmmov %vm3541_vm2 }
 0x28f   :  { %v710_v32 = vpop.xlane.xlu1 %709  ;;  %vm3544_vm9 = vmmov %vm3541_vm2 }
 0x290   :  { %v1484_v40 = vadd.f32 %v1468_v37, %v710_v32  ;;  %731 = vadd.xlane.f32.xlu0 %v2205_v25  ;;  %849 = vadd.xlane.f32.xlu1 %v2124_v60  ;;  %v2221_v16 = vpop.eup %2220  ;;  %v1424_v37 = vmul.f32 1.442695, %v1406_v53  ;;  %v1414_v32 = vmul.f32 14.285714, %v3538_v52  ;;  %vm3545_vm0 = vmmov %vm3541_vm2  ;;  %v1584_v53 = vld [vmem:[#allocation5 + $0x18] sm:$0xff] }
 0x291   :  { %vm3546_vm11 = vmmov %vm3545_vm0 }
 0x292   :  { %1501 = vst.msk [vmem:[#allocation3] sm:$0xff] %vm3534_vm15, %v1484_v40  ;;  %v2223_v8 = vpop.eup %2222  ;;  %v1440_v60 = vmul.f32 1.442695, %v1414_v32  ;;  %v1454_v40 = vld [vmem:[#allocation3 + $0x10] sm:$0xff]  ;;  %vm3547_vm15 = vmmov %vm3545_vm0 }
 0x293   :  { %vm3548_vm14 = vmmov %vm3545_vm0 }
 0x294   :  { %727 = vadd.xlane.f32.xlu0 %v2207_v33  ;;  %725 = vadd.xlane.f32.xlu1 %v2209_v48  ;;  %v2225_v58 = vpop.eup %2224  ;;  %v1535_v48 = vld [vmem:[#allocation4 + $0x10] sm:$0xff]  ;;  %vm3549_vm10 = vmmov %vm3545_vm0 }
 0x295   :  { %vm3550_vm12 = vmmov %vm3545_vm0 }
 0x296   :  { %vm3553_vm1 = vmmov %vm3545_vm0 }
 0x298   :  { %723 = vadd.xlane.f32.xlu0 %v2213_v21  ;;  %711 = vadd.xlane.f32.xlu1 %v2211_v22 }
 0x299   :  { %v1648_v43 = vld [vmem:[#allocation3] sm:$0xff] }
 0x29a   :  { %vm1664_vm8 = vcmp.gt.f32.partialorder %v1648_v43, 0.0 }
 0x29b   :  { %v1680_v26 = vsel %vm1664_vm8, %v1648_v43, 1.0  ;;  %vm3551_vm8 = vmmov %vm3545_vm0 }
 0x29c   :  { %739 = vadd.xlane.f32.xlu0 %v2215_v9  ;;  %721 = vadd.xlane.f32.xlu1 %v2217_v54  ;;  %2226 = vlog2.f32 %v1680_v26  ;;  %v1539_v9 = vld [vmem:[#allocation4 + $0x30] sm:$0xff]  ;;  %v1536_v54 = vld [vmem:[#allocation4 + $0x18] sm:$0xff] }
 0x29d   :  { %2228 = vpow2.f32 %v701_v39 }
 0x29e   :  { %2230 = vrcp.f32 %v1970_v49 }
 0x29f   :  { %2232 = vpow2.f32 %v1424_v37  ;;  %v1548_v37 = vld [vmem:[#allocation4 + $0x78] sm:$0xff] }
 0x2a0   :  { %719 = vadd.xlane.f32.xlu0 %v2219_v13  ;;  %737 = vadd.xlane.f32.xlu1 %v2221_v16  ;;  %2234 = vpow2.f32 %v1440_v60 }
 0x2a4   :  { %735 = vadd.xlane.f32.xlu0 %v2225_v58  ;;  %717 = vadd.xlane.f32.xlu1 %v2223_v8  ;;  %v1541_v8 = vld [vmem:[#allocation4 + $0x40] sm:$0xff]  ;;  %v1538_v58 = vld [vmem:[#allocation4 + $0x28] sm:$0xff] }
 0x2a6   :  { %v2227_v2 = vpop.eup %2226 }
 0x2a7   :  { %v2229_v36 = vpop.eup %2228  ;;  %v1697_v31 = vmul.f32 0.6931472, %v2227_v2 }
 0x2a8   :  { %851 = vadd.xlane.f32.xlu0 %v2125_v45  ;;  %733 = vadd.xlane.f32.xlu1 %v2229_v36  ;;  %v2231_v1 = vpop.eup %2230  ;;  %v1543_v45 = vld [vmem:[#allocation4 + $0x50] sm:$0xff] }
 0x2a9   :  { %v1792_v7 = vadd.f32 %v1744_v0, %v1697_v31  ;;  %v2233_v5 = vpop.eup %2232  ;;  %v1540_v31 = vld [vmem:[#allocation4 + $0x38] sm:$0xff] }
 0x2aa   :  { %v1470_v34 = vmul.f32 %v2233_v5, %v1454_v40  ;;  %v2235_v46 = vpop.eup %2234  ;;  %v3556_v40 = vsub.f32 %v2756_v24, %v2766_v50  ;;  %v3562_v50 = vld [vmem:[#allocation12_spill] sm:$0xff]  ;;  %v3563_v24 = vld [vmem:[#allocation11_spill] sm:$0xff] }
 0x2ab   :  { %v1808_v35 = vmul.f32 %v1792_v7, %v1632_v20  ;;  %v1478_v12 = vmul.f32 %v2235_v46, %v1462_v56  ;;  %v1586_v46 = vld [vmem:[#allocation5 + $0x28] sm:$0xff] }
 0x2ad   :  { %v1824_v14 = vsub.f32 %v1776_v11, %v1808_v35  ;;  %v1545_v11 = vld [vmem:[#allocation4 + $0x60] sm:$0xff]  ;;  %v1542_v35 = vld [vmem:[#allocation4 + $0x48] sm:$0xff] }
 0x2af   :  { %v1872_v59 = vmul.f32 %v1856_v29, %v1824_v14 }
 0x2b1   :  { %v1987_v27 = vmul.f32 %v2231_v1, %v1872_v59  ;;  %v1547_v1 = vld [vmem:[#allocation4 + $0x70] sm:$0xff] }
 0x2b3   :  { %v2018_v63 = vsel %vm1922_vm7, %v1987_v27, 0.0  ;;  %v1544_v27 = vld [vmem:[#allocation4 + $0x58] sm:$0xff]  ;;  %vm3552_vm7 = vmmov %vm3545_vm0 }
 0x2b4   :  { %v2034_v41 = vsel %vm3537_vm4, %v2018_v63, 0.0  ;;  %vm3554_vm4 = vmmov %vm3545_vm0 }
 0x2b5   :  { %v2065_v38 = vrot.slane %v2034_v41, 4 }
 0x2b7   :  { %v2066_v23 = vadd.f32 %v2065_v38, %v2034_v41 }
 0x2b9   :  { %v2067_v42 = vrot.slane %v2066_v23, 2 }
 0x2bb   :  { %v2068_v55 = vadd.f32 %v2067_v42, %v2066_v23  ;;  %v1582_v42 = vld [vmem:[#allocation5 + $0x8] sm:$0xff] }
 0x2bd   :  { %v2069_v25 = vrot.slane %v2068_v55, 1 }
 0x2bf   :  { %v2070_v4 = vadd.f32 %v2069_v25, %v2068_v55  ;;  %v1546_v55 = vld [vmem:[#allocation4 + $0x68] sm:$0xff] }
 0x2c1   :  { %v2071_v18 = vmul.f32 -1.0, %v2070_v4 }
 0x2c3   :  { %2074 = vperm.xlu1 %2183, %v2071_v18  }
 0x2dd   :  { %v714_v33 = vpop.xlane.xlu0 %713 }
 0x2de   :  { %v1486_v47 = vadd.f32 %v1470_v34, %v714_v33  ;;  %v1407_v34 = vmul.f32 14.285714, %v3556_v40  ;;  %v1583_v33 = vld [vmem:[#allocation5 + $0x10] sm:$0xff] }
 0x2e0   :  { %1503 = vst.msk [vmem:[#allocation3 + $0x10] sm:$0xff] %vm3539_vm13, %v1486_v47  ;;  %vm3555_vm13 = vmmov %vm3545_vm0 }
 0x2e1   :  { %v762_v15 = vpop.xlane.xlu0 %761  ;;  %v730_v57 = vpop.xlane.xlu1 %729 }
 0x2e2   :  { %v1551_v6 = vadd.f32 %v1535_v48, %v762_v15  ;;  %v1494_v22 = vadd.f32 %v1478_v12, %v730_v57  ;;  %v1426_v15 = vmul.f32 1.442695, %v1407_v34  ;;  %v3559_v57 = vsub.f32 %v2673_v30, %v2679_v44  ;;  %v3568_v30 = vld [vmem:[#allocation20_spill] sm:$0xff] }
 0x2e4   :  { %1567 = vst.msk [vmem:[#allocation4 + $0x10] sm:$0xff] %vm3540_vm5, %v1551_v6  ;;  %vm3557_vm5 = vmmov %vm3545_vm0  ;;  %v1415_v6 = vmul.f32 14.285714, %v3559_v57  ;;  %2236 = vpow2.f32 %v1426_v15 }
 0x2e5   :  { %1511 = vst.msk [vmem:[#allocation3 + $0x50] sm:$0xff] %vm3541_vm2, %v1494_v22  ;;  %v766_v10 = vpop.xlane.xlu0 %765  ;;  %v760_v21 = vpop.xlane.xlu1 %759  ;;  %vm3558_vm2 = vmmov %vm3545_vm0  ;;  %v1588_v22 = vld [vmem:[#allocation5 + $0x38] sm:$0xff] }
 0x2e6   :  { %v1553_v39 = vadd.f32 %v1537_v28, %v766_v10  ;;  %v1550_v43 = vadd.f32 %v1534_v61, %v760_v21  ;;  %v1585_v28 = vld [vmem:[#allocation5 + $0x20] sm:$0xff]  ;;  %v1395_v61 = vsub.f32 %v3563_v24, %v3562_v50 }
 0x2e8   :  { %1569 = vst.msk [vmem:[#allocation4 + $0x20] sm:$0xff] %vm3542_vm3, %v1553_v39  ;;  %vm3560_vm3 = vmmov %vm3545_vm0  ;;  %v3564_v39 = vld [vmem:[#allocation9_spill] sm:$0xff] }
 0x2e9   :  { %1566 = vst.msk [vmem:[#allocation4 + $0x8] sm:$0xff] %vm3543_vm6, %v1550_v43  ;;  %v770_v26 = vpop.xlane.xlu0 %769  ;;  %v764_v20 = vpop.xlane.xlu1 %763  ;;  %vm3561_vm6 = vmmov %vm3545_vm0  ;;  %v3565_v43 = vld [vmem:[#allocation10_spill] sm:$0xff] }
 0x2ea   :  { %v1555_v13 = vadd.f32 %v1539_v9, %v770_v26  ;;  %v1552_v16 = vadd.f32 %v1536_v54, %v764_v20  ;;  %v3566_v9 = vsub.f32 %v3564_v39, %v3565_v43 }
 0x2ec   :  { %1571 = vst.msk [vmem:[#allocation4 + $0x30] sm:$0xff] %vm3544_vm9, %v1555_v13  ;;  %v1413_v54 = vmul.f32 14.285714, %v3566_v9  ;;  %v3567_v13 = vld [vmem:[#allocation19_spill] sm:$0xff]  ;;  %vm3570_vm9 = vmmov %vm3545_vm0 }
 0x2ed   :  { %1568 = vst.msk [vmem:[#allocation4 + $0x18] sm:$0xff] %vm3545_vm0, %v1552_v16  ;;  %v774_v49 = vpop.xlane.xlu0 %773  ;;  %v768_v17 = vpop.xlane.xlu1 %767  ;;  %v3569_v44 = vsub.f32 %v3567_v13, %v3568_v30  ;;  %v1463_v9 = vld [vmem:[#allocation3 + $0x58] sm:$0xff] }
 0x2ee   :  { %v1557_v2 = vadd.f32 %v1541_v8, %v774_v49  ;;  %v1554_v36 = vadd.f32 %v1538_v58, %v768_v17  ;;  %v1442_v8 = vmul.f32 1.442695, %v1415_v6  ;;  %v1590_v58 = vld [vmem:[#allocation5 + $0x48] sm:$0xff]  ;;  %v1587_v49 = vld [vmem:[#allocation5 + $0x30] sm:$0xff]  ;;  %v1411_v17 = vmul.f32 14.285714, %v1395_v61 }
 0x2ef   :  { %v1412_v16 = vmul.f32 14.285714, %v3569_v44  ;;  %v1593_v61 = vld [vmem:[#allocation5 + $0x60] sm:$0xff]  ;;  %v3592_v44 = vld [vmem:[#allocation27_spill] sm:$0xff] }
 0x2f0   :  { %1573 = vst.msk [vmem:[#allocation4 + $0x40] sm:$0xff] %vm3546_vm11, %v1557_v2  ;;  %v3571_v2 = vld [vmem:[#allocation14_spill] sm:$0xff]  ;;  %2238 = vpow2.f32 %v1442_v8  ;;  %vm3576_vm11 = vmmov %vm3545_vm0 }
 0x2f1   :  { %1570 = vst.msk [vmem:[#allocation4 + $0x28] sm:$0xff] %vm3547_vm15, %v1554_v36  ;;  %v778_v0 = vpop.xlane.xlu0 %777  ;;  %v772_v3 = vpop.xlane.xlu1 %771  ;;  %v3572_v36 = vld [vmem:[#allocation13_spill] sm:$0xff]  ;;  %vm3577_vm15 = vmmov %vm3545_vm0 }
 0x2f2   :  { %v1559_v19 = vadd.f32 %v1543_v45, %v778_v0  ;;  %v1556_v7 = vadd.f32 %v1540_v31, %v772_v3  ;;  %v1403_v45 = vsub.f32 %v3572_v36, %v3571_v2  ;;  %v1438_v3 = vmul.f32 1.442695, %v1413_v54 }
 0x2f4   :  { %1575 = vst.msk [vmem:[#allocation4 + $0x50] sm:$0xff] %vm3548_vm14, %v1559_v19  ;;  %2240 = vpow2.f32 %v1438_v3  ;;  %vm3583_vm14 = vmmov %vm3545_vm0  ;;  %v1460_v3 = vld [vmem:[#allocation3 + $0x40] sm:$0xff] }
 0x2f5   :  { %1572 = vst.msk [vmem:[#allocation4 + $0x38] sm:$0xff] %vm3549_vm10, %v1556_v7  ;;  %v782_v51 = vpop.xlane.xlu0 %781  ;;  %v776_v29 = vpop.xlane.xlu1 %775  ;;  %vm3584_vm10 = vmmov %vm3545_vm0 }
 0x2f6   :  { %v1561_v14 = vadd.f32 %v1545_v11, %v782_v51  ;;  %v1558_v59 = vadd.f32 %v1542_v35, %v776_v29  ;;  %v1436_v11 = vmul.f32 1.442695, %v1412_v16  ;;  %v3573_v35 = vld [vmem:[#allocation21_spill] sm:$0xff]  ;;  %v3574_v51 = vld [vmem:[#allocation22_spill] sm:$0xff]  ;;  %v3593_v16 = vld [vmem:[#allocation28_spill] sm:$0xff] }
 0x2f7   :  { %v3575_v29 = vsub.f32 %v3573_v35, %v3574_v51  ;;  %v3594_v8 = vsub.f32 %v3592_v44, %v3593_v16 }
 0x2f8   :  { %1577 = vst.msk [vmem:[#allocation4 + $0x60] sm:$0xff] %vm3550_vm12, %v1561_v14  ;;  %2242 = vpow2.f32 %v1436_v11  ;;  %vm3590_vm12 = vmmov %vm3545_vm0 }
 0x2f9   :  { %1574 = vst.msk [vmem:[#allocation4 + $0x48] sm:$0xff] %vm3551_vm8, %v1558_v59  ;;  %v786_v63 = vpop.xlane.xlu0 %785  ;;  %v780_v41 = vpop.xlane.xlu1 %779  ;;  %v1405_v14 = vmul.f32 14.285714, %v3575_v29  ;;  %v1592_v59 = vld [vmem:[#allocation5 + $0x58] sm:$0xff]  ;;  %vm3591_vm8 = vmmov %vm3545_vm0  ;;  %v3597_v29 = vld [vmem:[#allocation29_spill] sm:$0xff] }
 0x2fa   :  { %v1563_v38 = vadd.f32 %v1547_v1, %v786_v63  ;;  %v1560_v23 = vadd.f32 %v1544_v27, %v780_v41  ;;  %v1589_v1 = vld [vmem:[#allocation5 + $0x40] sm:$0xff]  ;;  %v1434_v27 = vmul.f32 1.442695, %v1411_v17  ;;  %v1419_v63 = vmul.f32 14.285714, %v1403_v45 }
 0x2fc   :  { %1579 = vst.msk [vmem:[#allocation4 + $0x70] sm:$0xff] %vm3552_vm7, %v1563_v38  ;;  %2244 = vpow2.f32 %v1434_v27  ;;  %v1450_v40 = vmul.f32 1.442695, %v1419_v63  ;;  %vm3595_vm7 = vmmov %vm3545_vm0 }
 0x2fd   :  { %1576 = vst.msk [vmem:[#allocation4 + $0x58] sm:$0xff] %vm3553_vm1, %v1560_v23  ;;  %v824_v25 = vpop.xlane.xlu0 %823  ;;  %v784_v4 = vpop.xlane.xlu1 %783  ;;  %v3578_v23 = vld [vmem:[#allocation16_spill] sm:$0xff]  ;;  %vm3596_vm1 = vmmov %vm3545_vm0 }
 0x2fe   :  { %v1598_v18 = vadd.f32 %v1582_v42, %v824_v25  ;;  %v1562_v62 = vadd.f32 %v1546_v55, %v784_v4  ;;  %v3579_v42 = vld [vmem:[#allocation15_spill] sm:$0xff] }
 0x2ff   :  { %v1393_v55 = vsub.f32 %v3579_v42, %v3578_v23  ;;  %v1459_v42 = vld [vmem:[#allocation3 + $0x38] sm:$0xff] }
 0x300   :  { %1614 = vst.msk [vmem:[#allocation5 + $0x8] sm:$0xff] %vm3554_vm4, %v1598_v18  ;;  %v1422_v18 = vmul.f32 1.442695, %v1405_v14  ;;  %v3598_v14 = vld [vmem:[#allocation30_spill] sm:$0xff]  ;;  %vm3600_vm4 = vmmov %vm3545_vm0 }
 0x301   :  { %1578 = vst.msk [vmem:[#allocation4 + $0x68] sm:$0xff] %vm3555_vm13, %v1562_v62  ;;  %v828_v52 = vpop.xlane.xlu0 %827  ;;  %v788_v32 = vpop.xlane.xlu1 %787  ;;  %v3580_v62 = vld [vmem:[#allocation23_spill] sm:$0xff]  ;;  %vm3601_vm13 = vmmov %vm3545_vm0 }
 0x302   :  { %v1600_v60 = vadd.f32 %v1584_v53, %v828_v52  ;;  %v1564_v5 = vadd.f32 %v1548_v37, %v788_v32  ;;  %v3581_v53 = vld [vmem:[#allocation24_spill] sm:$0xff]  ;;  %v1594_v32 = vld [vmem:[#allocation5 + $0x68] sm:$0xff]  ;;  %2246 = vpow2.f32 %v1422_v18 }
 0x303   :  { %v3582_v37 = vsub.f32 %v3580_v62, %v3581_v53  ;;  %2248 = vpow2.f32 %v1450_v40  ;;  %v1458_v40 = vld [vmem:[#allocation3 + $0x30] sm:$0xff] }
 0x304   :  { %1616 = vst.msk [vmem:[#allocation5 + $0x18] sm:$0xff] %vm3557_vm5, %v1600_v60  ;;  %v1591_v60 = vld [vmem:[#allocation5 + $0x50] sm:$0xff]  ;;  %vm3602_vm5 = vmmov %vm3545_vm0 }
 0x305   :  { %1580 = vst.msk [vmem:[#allocation4 + $0x78] sm:$0xff] %vm3558_vm2, %v1564_v5  ;;  %v832_v56 = vpop.xlane.xlu0 %831  ;;  %v826_v47 = vpop.xlane.xlu1 %825  ;;  %v1410_v52 = vmul.f32 14.285714, %v3582_v37  ;;  %vm3603_vm2 = vmmov %vm3545_vm0 }
 0x306   :  { %v1602_v48 = vadd.f32 %v1586_v46, %v832_v56  ;;  %v1599_v12 = vadd.f32 %v1583_v33, %v826_v47  ;;  %v2237_v5 = vpop.eup %2236  ;;  %v1455_v33 = vld [vmem:[#allocation3 + $0x18] sm:$0xff]  ;;  %v1409_v56 = vmul.f32 14.285714, %v1393_v55  ;;  %v3585_v47 = vld [vmem:[#allocation18_spill] sm:$0xff]  ;;  %v1453_v55 = vld [vmem:[#allocation3 + $0x8] sm:$0xff] }
 0x307   :  { %v1432_v6 = vmul.f32 1.442695, %v1410_v52 }
 0x308   :  { %1618 = vst.msk [vmem:[#allocation5 + $0x28] sm:$0xff] %vm3560_vm3, %v1602_v48  ;;  %v3586_v48 = vld [vmem:[#allocation17_spill] sm:$0xff]  ;;  %v1430_v54 = vmul.f32 1.442695, %v1409_v56  ;;  %vm3604_vm3 = vmmov %vm3545_vm0 }
 0x309   :  { %1615 = vst.msk [vmem:[#allocation5 + $0x10] sm:$0xff] %vm3561_vm6, %v1599_v12  ;;  %v836_v10 = vpop.xlane.xlu0 %835  ;;  %v830_v21 = vpop.xlane.xlu1 %829  ;;  %v1401_v12 = vsub.f32 %v3586_v48, %v3585_v47  ;;  %2250 = vpow2.f32 %v1432_v6  ;;  %vm3605_vm6 = vmmov %vm3545_vm0  ;;  %v1466_v6 = vld [vmem:[#allocation3 + $0x70] sm:$0xff] }
 0x30a   :  { %v1604_v26 = vadd.f32 %v1588_v22, %v836_v10  ;;  %v1601_v20 = vadd.f32 %v1585_v28, %v830_v21  ;;  %v3587_v22 = vld [vmem:[#allocation25_spill] sm:$0xff]  ;;  %v3588_v28 = vld [vmem:[#allocation26_spill] sm:$0xff]  ;;  %v1471_v10 = vmul.f32 %v2237_v5, %v1455_v33  ;;  %v2239_v21 = vpop.eup %2238  ;;  %2252 = vpow2.f32 %v1430_v54  ;;  %v1467_v5 = vld [vmem:[#allocation3 + $0x78] sm:$0xff] }
 0x30b   :  { %v3589_v50 = vsub.f32 %v3587_v22, %v3588_v28  ;;  %v2241_v17 = vpop.eup %2240  ;;  %v1479_v2 = vmul.f32 %v2239_v21, %v1463_v9  ;;  %v1456_v9 = vld [vmem:[#allocation3 + $0x20] sm:$0xff] }
 0x30c   :  { %1620 = vst.msk [vmem:[#allocation5 + $0x38] sm:$0xff] %vm3570_vm9, %v1604_v26  ;;  %v1417_v26 = vmul.f32 14.285714, %v1401_v12  ;;  %v2243_v36 = vpop.eup %2242  ;;  %vm3606_vm9 = vmmov %vm3545_vm0 }
 0x30d   :  { %1617 = vst.msk [vmem:[#allocation5 + $0x20] sm:$0xff] %vm3545_vm0, %v1601_v20  ;;  %v840_v31 = vpop.xlane.xlu0 %839  ;;  %v834_v0 = vpop.xlane.xlu1 %833  ;;  %v1418_v24 = vmul.f32 14.285714, %v3589_v50  ;;  %v1476_v63 = vmul.f32 %v2243_v36, %v1460_v3 }
 0x30e   :  { %v1606_v19 = vadd.f32 %v1590_v58, %v840_v31  ;;  %v1603_v7 = vadd.f32 %v1587_v49, %v834_v0  ;;  %v1408_v58 = vmul.f32 14.285714, %v3594_v8  ;;  %v1595_v49 = vld [vmem:[#allocation5 + $0x70] sm:$0xff]  ;;  %v1461_v0 = vld [vmem:[#allocation3 + $0x48] sm:$0xff]  ;;  %v2245_v35 = vpop.eup %2244  ;;  %v1464_v8 = vld [vmem:[#allocation3 + $0x60] sm:$0xff] }
 0x30f   :  { %v1448_v30 = vmul.f32 1.442695, %v1418_v24  ;;  %v1477_v27 = vmul.f32 %v2241_v17, %v1461_v0  ;;  %v1475_v53 = vmul.f32 %v2245_v35, %v1459_v42  ;;  %v1596_v17 = vld [vmem:[#allocation5 + $0x78] sm:$0xff] }
 0x310   :  { %1622 = vst.msk [vmem:[#allocation5 + $0x48] sm:$0xff] %vm3576_vm11, %v1606_v19  ;;  %v1446_v19 = vmul.f32 1.442695, %v1417_v26  ;;  %v1428_v51 = vmul.f32 1.442695, %v1408_v58  ;;  %vm3607_vm11 = vmmov %vm3545_vm0 }
 0x311   :  { %1619 = vst.msk [vmem:[#allocation5 + $0x30] sm:$0xff] %vm3577_vm15, %v1603_v7  ;;  %v844_v41 = vpop.xlane.xlu0 %843  ;;  %v838_v38 = vpop.xlane.xlu1 %837  ;;  %2254 = vpow2.f32 %v1448_v30  ;;  %vm3608_vm15 = vmmov %vm3545_vm0 }
 0x312   :  { %v1608_v25 = vadd.f32 %v1592_v59, %v844_v41  ;;  %v1605_v4 = vadd.f32 %v1589_v1, %v838_v38  ;;  %v3599_v59 = vsub.f32 %v3597_v29, %v3598_v14  ;;  %v2247_v41 = vpop.eup %2246  ;;  %2256 = vpow2.f32 %v1446_v19 }
 0x313   :  { %v2249_v18 = vpop.eup %2248  ;;  %2258 = vpow2.f32 %v1428_v51  ;;  %v1469_v37 = vmul.f32 %v2247_v41, %v1453_v55 }
 0x314   :  { %1624 = vst.msk [vmem:[#allocation5 + $0x58] sm:$0xff] %vm3583_vm14, %v1608_v25  ;;  %v1416_v1 = vmul.f32 14.285714, %v3599_v59  ;;  %v2251_v52 = vpop.eup %2250  ;;  %v1483_v56 = vmul.f32 %v2249_v18, %v1467_v5  ;;  %vm3609_vm14 = vmmov %vm3545_vm0 }
 0x315   :  { %1621 = vst.msk [vmem:[#allocation5 + $0x40] sm:$0xff] %vm3584_vm10, %v1605_v4  ;;  %v848_v34 = vpop.xlane.xlu0 %847  ;;  %v842_v46 = vpop.xlane.xlu1 %841  ;;  %v1474_v47 = vmul.f32 %v2251_v52, %v1458_v40  ;;  %vm3610_vm10 = vmmov %vm3545_vm0 }
 0x316   :  { %v1610_v15 = vadd.f32 %v1594_v32, %v848_v34  ;;  %v1607_v57 = vadd.f32 %v1591_v60, %v842_v46  ;;  %v1444_v62 = vmul.f32 1.442695, %v1416_v1  ;;  %v2253_v33 = vpop.eup %2252 }
 0x318   :  { %1626 = vst.msk [vmem:[#allocation5 + $0x68] sm:$0xff] %vm3590_vm12, %v1610_v15  ;;  %2260 = vpow2.f32 %v1444_v62  ;;  %vm3611_vm12 = vmmov %vm3545_vm0 }
 0x319   :  { %1623 = vst.msk [vmem:[#allocation5 + $0x50] sm:$0xff] %vm3591_vm8, %v1607_v57  ;;  %v716_v39 = vpop.xlane.xlu0 %715  ;;  %v846_v43 = vpop.xlane.xlu1 %845  ;;  %v1457_v57 = vld [vmem:[#allocation3 + $0x28] sm:$0xff]  ;;  %vm3612_vm8 = vmmov %vm3545_vm0 }
 0x31a   :  { %v1487_v20 = vadd.f32 %v1471_v10, %v716_v39  ;;  %v1609_v13 = vadd.f32 %v1593_v61, %v846_v43  ;;  %v1473_v24 = vmul.f32 %v2253_v33, %v1457_v57  ;;  %v1465_v43 = vld [vmem:[#allocation3 + $0x68] sm:$0xff] }
 0x31b   :  { %v2255_v48 = vpop.eup %2254 }
 0x31c   :  { %1504 = vst.msk [vmem:[#allocation3 + $0x18] sm:$0xff] %vm3595_vm7, %v1487_v20  ;;  %v2257_v50 = vpop.eup %2256  ;;  %v1482_v61 = vmul.f32 %v2255_v48, %v1466_v6 }
 0x31d   :  { %1625 = vst.msk [vmem:[#allocation5 + $0x60] sm:$0xff] %vm3596_vm1, %v1609_v13  ;;  %v732_v45 = vpop.xlane.xlu0 %731  ;;  %v850_v31 = vpop.xlane.xlu1 %849  ;;  %v1481_v20 = vmul.f32 %v2257_v50, %v1465_v43 }
 0x31e   :  { %v1495_v7 = vadd.f32 %v1479_v2, %v732_v45  ;;  %v1611_v11 = vadd.f32 %v1595_v49, %v850_v31  ;;  %v2259_v10 = vpop.eup %2258 }
 0x31f   :  { %v1472_v13 = vmul.f32 %v2259_v10, %v1456_v9 }
 0x320   :  { %1512 = vst.msk [vmem:[#allocation3 + $0x58] sm:$0xff] %vm3600_vm4, %v1495_v7 }
 0x321   :  { %1627 = vst.msk [vmem:[#allocation5 + $0x70] sm:$0xff] %vm3601_vm13, %v1611_v11  ;;  %v728_v38 = vpop.xlane.xlu0 %727  ;;  %v726_v23 = vpop.xlane.xlu1 %725 }
 0x322   :  { %v1493_v25 = vadd.f32 %v1477_v27, %v728_v38  ;;  %v1492_v4 = vadd.f32 %v1476_v63, %v726_v23  ;;  %v2261_v30 = vpop.eup %2260 }
 0x323   :  { %v1480_v2 = vmul.f32 %v2261_v30, %v1464_v8 }
 0x324   :  { %1510 = vst.msk [vmem:[#allocation3 + $0x48] sm:$0xff] %vm3602_vm5, %v1493_v25 }
 0x325   :  { %1509 = vst.msk [vmem:[#allocation3 + $0x40] sm:$0xff] %vm3603_vm2, %v1492_v4  ;;  %v724_v32 = vpop.xlane.xlu0 %723  ;;  %v712_v60 = vpop.xlane.xlu1 %711 }
 0x326   :  { %v1491_v34 = vadd.f32 %v1475_v53, %v724_v32  ;;  %v1485_v46 = vadd.f32 %v1469_v37, %v712_v60 }
 0x328   :  { %1508 = vst.msk [vmem:[#allocation3 + $0x38] sm:$0xff] %vm3604_vm3, %v1491_v34 }
 0x329   :  { %1502 = vst.msk [vmem:[#allocation3 + $0x8] sm:$0xff] %vm3605_vm6, %v1485_v46  ;;  %v740_v12 = vpop.xlane.xlu0 %739  ;;  %v722_v15 = vpop.xlane.xlu1 %721 }
 0x32a   :  { %v1499_v22 = vadd.f32 %v1483_v56, %v740_v12  ;;  %v1490_v28 = vadd.f32 %v1474_v47, %v722_v15 }
 0x32c   :  { %1516 = vst.msk [vmem:[#allocation3 + $0x78] sm:$0xff] %vm3606_vm9, %v1499_v22 }
 0x32d   :  { %1507 = vst.msk [vmem:[#allocation3 + $0x30] sm:$0xff] %vm3545_vm0, %v1490_v28  ;;  %v720_v21 = vpop.xlane.xlu0 %719  ;;  %v738_v39 = vpop.xlane.xlu1 %737 }
 0x32e   :  { %v1489_v54 = vadd.f32 %v1473_v24, %v720_v21  ;;  %v1498_v26 = vadd.f32 %v1482_v61, %v738_v39 }
 0x330   :  { %1506 = vst.msk [vmem:[#allocation3 + $0x28] sm:$0xff] %vm3607_vm11, %v1489_v54 }
 0x331   :  { %1515 = vst.msk [vmem:[#allocation3 + $0x70] sm:$0xff] %vm3608_vm15, %v1498_v26  ;;  %v736_v44 = vpop.xlane.xlu0 %735  ;;  %v718_v16 = vpop.xlane.xlu1 %717 }
 0x332   :  { %v1497_v58 = vadd.f32 %v1481_v20, %v736_v44  ;;  %v1488_v49 = vadd.f32 %v1472_v13, %v718_v16 }
 0x334   :  { %1514 = vst.msk [vmem:[#allocation3 + $0x68] sm:$0xff] %vm3609_vm14, %v1497_v58 }
 0x335   :  { %1505 = vst.msk [vmem:[#allocation3 + $0x20] sm:$0xff] %vm3610_vm10, %v1488_v49  ;;  %v852_v36 = vpop.xlane.xlu0 %851  ;;  %v734_v45 = vpop.xlane.xlu1 %733 }
 0x336   :  { %v1612_v31 = vadd.f32 %v1596_v17, %v852_v36  ;;  %v1496_v0 = vadd.f32 %v1480_v2, %v734_v45 }
 0x338   :  { %1628 = vst.msk [vmem:[#allocation5 + $0x78] sm:$0xff] %vm3611_vm12, %v1612_v31 }
 0x339   :  { %1513 = vst.msk [vmem:[#allocation3 + $0x60] sm:$0xff] %vm3612_vm8, %v1496_v0 }
 0x342   :  { %v2075_v3 = vpop.permute.xlu1 %2074 }
 0x343   :  { %2077 = vst [vmem:[#allocation6] sm:$0xff] %v2075_v3 }
 0x344   :  { %2274 = shalt.err (!%p2271_p4)
}
 0x345   :  { %s2275_s19 = scalar_lea.hbm %s3385_s4, 128 }
 0x346   :  { %p2276_p5 = scmp.ne.s32.totalorder %s3385_s4, %s2275_s19  ;;  %p2279_p6 = scmp.lt.u32.totalorder %s2275_s19, %s3385_s4 }
 0x348   :  { %p2281_p7 = pnand %p2279_p6, %p2276_p5 }
 0x34a   :  { %2284 = shalt.err (!%p2281_p7)
}
 0x34b   :  { %2087 = dma.vmem_to_hbm [thread:$0]  %s2085_s15, 128, %s3385_s4, [#allocation7]  }
 0x34c   :  { %2285 = dma.done.wait [#allocation7], 128  }
 0x34d   :  { %2286 = vsyncadd [#allocation7], 4294967168 }
 0x34e   :  { %2091 = vsyncpa [#allocation7], 1 }

</bundles_post_ra>
